<compile_context>
chip_gen: v5e
topology: v5e:2x2
jax: 0.10.0
libtpu: 0.0.40
codegen_flags: <defaults>
</compile_context>

<pallas_src>
import functools
from typing import NamedTuple

import jax
import jax.numpy as jnp
from jax.experimental import pallas as pl
from jax.experimental.pallas import tpu as pltpu

LANE = 128


def _round_up(n, m):
    return ((n + m - 1) // m) * m


class FusedParams(NamedTuple):
    W1: jax.Array  # [in_dim, 3*hidden]         bf16
    b1: jax.Array  # [1, 3*hidden]              f32
    W2: jax.Array  # [3*hidden, padded_classes] bf16  (ensemble w folded in, lane-padded)
    b2: jax.Array  # [1, padded_classes]        f32   (ensemble w folded in, lane-padded)


def fuse_wens3_params(params, w):
    """One-time fusion of the 3 sub-models + ensemble weights (hoisted out of forward)."""
    w = jnp.asarray(w, jnp.float32)
    (W1a, b1a, W2a, b2a), (W1b, b1b, W2b, b2b), (W1c, b1c, W2c, b2c) = params
    num_classes = W2a.shape[1]

    W1_cat = jnp.concatenate([W1a, W1b, W1c], axis=1)                  # [in, 3H]
    b1_cat = jnp.concatenate([b1a, b1b, b1c], axis=0).reshape(1, -1)   # [1, 3H]
    W2_cat = jnp.concatenate([w[0] * W2a, w[1] * W2b, w[2] * W2c],
                             axis=0)                                   # [3H, C]
    b2_cat = (w[0] * b2a + w[1] * b2b + w[2] * b2c).reshape(1, -1)     # [1, C]

    # Lane-dense output: zero-pad classes up to a multiple of 128.
    padded_classes = _round_up(num_classes, LANE)
    if padded_classes != num_classes:
        W2_cat = jnp.pad(W2_cat, ((0, 0), (0, padded_classes - num_classes)))
        b2_cat = jnp.pad(b2_cat, ((0, 0), (0, padded_classes - num_classes)))

    fused = FusedParams(
        W1=W1_cat.astype(jnp.bfloat16),
        b1=b1_cat.astype(jnp.float32),
        W2=W2_cat.astype(jnp.bfloat16),
        b2=b2_cat.astype(jnp.float32),
    )
    return fused, num_classes


def wens3_kernel(x_ref,    # VMEM (bb, in_dim)                f32 (cast to bf16 in-kernel)
                 w1_ref,   # VMEM (in_dim, 3*hidden)          bf16
                 b1_ref,   # VMEM (1, 3*hidden)               f32
                 w2_ref,   # VMEM (3*hidden, padded_classes)  bf16 (ensemble w folded in)
                 b2_ref,   # VMEM (1, padded_classes)         f32  (ensemble w folded in)
                 o_ref):   # VMEM (bb, padded_classes)        f32
    # Cast x to bf16 on the VPU (removes a separate HBM cast pass in the wrapper).
    x_bf = x_ref[...].astype(jnp.bfloat16)
    # Layer 1 (all three sub-models at once), f32 accumulation on the MXU.
    h = jnp.dot(x_bf, w1_ref[...], preferred_element_type=jnp.float32)
    h = jnp.maximum(h + b1_ref[...], 0.0)
    # Layer 2 + weighted ensemble combine (folded into W2_cat / b2_cat).
    y = jnp.dot(h.astype(w2_ref.dtype), w2_ref[...],
                preferred_element_type=jnp.float32)
    o_ref[...] = (y + b2_ref[...]).astype(o_ref.dtype)


@functools.partial(jax.jit, static_argnames=("num_classes", "block_b"))
def wens3_forward(x_nchw, fused: FusedParams, num_classes, block_b=512):
    """x_nchw: [B, C, H, W] f32; fused: precomputed FusedParams."""
    B = x_nchw.shape[0]
    x_flat = x_nchw.reshape(B, -1).astype(jnp.float32)   # == torch x.view(B, -1)
    in_dim = x_flat.shape[1]
    three_h = fused.W1.shape[1]
    padded_classes = fused.W2.shape[1]

    # Fixed batch tile + padding (never the whole-batch fallback):
    #  - small B: single sublane-aligned tile
    #  - large B: block_b rows per step -> pipelined DMA, 2-TC sharding on v7x,
    #    bounded VMEM (~8 MiB resident at block_b=512).
    bb = min(block_b, _round_up(B, 8))
    B_pad = _round_up(B, bb)
    if B_pad != B:
        x_flat = jnp.pad(x_flat, ((0, B_pad - B), (0, 0)))
    grid = (B_pad // bb,)

    grid_spec = pltpu.PrefetchScalarGridSpec(
        num_scalar_prefetch=0,
        grid=grid,
        in_specs=[
            pl.BlockSpec((bb, in_dim), lambda i: (i, 0)),                  # x tile (f32)
            pl.BlockSpec((in_dim, three_h), lambda i: (0, 0)),             # W1_cat
            pl.BlockSpec((1, three_h), lambda i: (0, 0)),                  # b1_cat
            pl.BlockSpec((three_h, padded_classes), lambda i: (0, 0)),     # W2_cat
            pl.BlockSpec((1, padded_classes), lambda i: (0, 0)),           # b2_cat
        ],
        out_specs=pl.BlockSpec((bb, padded_classes), lambda i: (i, 0)),
    )

    out = pl.pallas_call(
        wens3_kernel,
        out_shape=jax.ShapeDtypeStruct((B_pad, padded_classes), jnp.float32),
        grid_spec=grid_spec,
        compiler_params=pltpu.CompilerParams(
            dimension_semantics=("parallel",)),
    )(x_flat, fused.W1, fused.b1, fused.W2, fused.b2)

    # Strip batch padding and the lane-padding of the class dimension.
    return out[:B, :num_classes]


def _make_params(key, in_dim, hidden, num_classes):
    """Deterministic synthetic parameters for one sub-model."""
    k1, k2, k3, k4 = jax.random.split(key, 4)
    W1 = jax.random.normal(k1, (in_dim, hidden), jnp.float32) * 0.02
    b1 = jax.random.normal(k2, (hidden,), jnp.float32) * 0.01
    W2 = jax.random.normal(k3, (hidden, num_classes), jnp.float32) * 0.02
    b2 = jax.random.normal(k4, (num_classes,), jnp.float32) * 0.01
    return (W1, b1, W2, b2)


if __name__ == "__main__":
    key = jax.random.PRNGKey(0)
    kx, k1, k2, k3 = jax.random.split(key, 4)

    B, C, H, W = 2, 4, 16, 16
    in_dim = C * H * W
    hidden = 128
    num_classes = 10

    x = jax.random.normal(kx, (B, C, H, W), jnp.float32)
    params = [
        _make_params(k1, in_dim, hidden, num_classes),
        _make_params(k2, in_dim, hidden, num_classes),
        _make_params(k3, in_dim, hidden, num_classes),
    ]
    w_ens = jnp.array([0.5, 0.3, 0.2], dtype=jnp.float32)

    # Weight fusion precomputed ONCE (not per forward call).
    fused, nc = fuse_wens3_params(params, w_ens)

    y = wens3_forward(x, fused, num_classes=nc)
    y = jax.block_until_ready(y)

    # Pure-f32 JAX reference (matches the PyTorch forward exactly).
    xf = x.reshape(B, -1)
    ref = jnp.zeros((B, num_classes), jnp.float32)
    for wi, (W1, b1, W2, b2) in zip(w_ens, params):
        ref = ref + wi * (jnp.maximum(xf @ W1 + b1, 0.0) @ W2 + b2)

    # bf16 matmul inputs -> relaxed tolerance vs. the f32 reference.
    assert y.shape == (B, num_classes)
    assert jnp.allclose(y, ref, atol=2e-2, rtol=2e-2), "mismatch vs reference"

    print("KERNEL_OK")
</pallas_src>

<mosaic_0001>
module attributes {stable_mosaic.version = 11 : i64} {
  func.func @wens3_kernel(%arg0: i32, %arg1: memref<8x1024xf32, #tpu.memory_space<vmem>>, %arg2: memref<1024x384xbf16, #tpu.memory_space<vmem>>, %arg3: memref<1x384xf32, #tpu.memory_space<vmem>>, %arg4: memref<384x128xbf16, #tpu.memory_space<vmem>>, %arg5: memref<1x128xf32, #tpu.memory_space<vmem>>, %arg6: memref<8x128xf32, #tpu.memory_space<vmem>>) attributes {dimension_semantics = [#tpu.dimension_semantics<parallel>], iteration_bounds = array<i64: 1>, scalar_prefetch = 0 : i64, scratch_operands = 0 : i64, tpu.core_type = #tpu.core_type<tc>, window_params = [{transform_indices = @transform_0, window_bounds = array<i64: 8, 1024>}, {pipeline_mode = #tpu.pipeline_mode<synchronous>, transform_indices = @transform_1, window_bounds = array<i64: 1024, 384>}, {pipeline_mode = #tpu.pipeline_mode<synchronous>, transform_indices = @transform_2, window_bounds = array<i64: 1, 384>}, {pipeline_mode = #tpu.pipeline_mode<synchronous>, transform_indices = @transform_3, window_bounds = array<i64: 384, 128>}, {pipeline_mode = #tpu.pipeline_mode<synchronous>, transform_indices = @transform_4, window_bounds = array<i64: 1, 128>}, {transform_indices = @transform_5, window_bounds = array<i64: 8, 128>}]} {
    %c0 = arith.constant 0 : index
    %c0_0 = arith.constant 0 : index
    %0 = vector.load %arg1[%c0, %c0_0] : memref<8x1024xf32, #tpu.memory_space<vmem>>, vector<8x1024xf32>
    %1 = arith.truncf %0 : vector<8x1024xf32> to vector<8x1024xbf16>
    %c0_1 = arith.constant 0 : index
    %c0_2 = arith.constant 0 : index
    %2 = vector.load %arg2[%c0_1, %c0_2] : memref<1024x384xbf16, #tpu.memory_space<vmem>>, vector<1024x384xbf16>
    %cst = arith.constant dense<0.000000e+00> : vector<8x384xf32>
    %3 = tpu.matmul %1, %2, %cst {dimension_numbers = #tpu.dot_dimension_numbers<[1], [0], [0], [1], [0, 0, 1, 1], [], []>} : vector<8x1024xbf16>, vector<1024x384xbf16>, vector<8x384xf32> -> vector<8x384xf32>
    %c0_3 = arith.constant 0 : index
    %c0_4 = arith.constant 0 : index
    %4 = vector.load %arg3[%c0_3, %c0_4] : memref<1x384xf32, #tpu.memory_space<vmem>>, vector<1x384xf32>
    %5 = vector.broadcast %4 : vector<1x384xf32> to vector<8x384xf32>
    %6 = arith.addf %3, %5 : vector<8x384xf32>
    %cst_5 = arith.constant 0.000000e+00 : f32
    %7 = vector.broadcast %cst_5 : f32 to vector<8x384xf32>
    %8 = arith.maximumf %6, %7 : vector<8x384xf32>
    %9 = arith.truncf %8 : vector<8x384xf32> to vector<8x384xbf16>
    %c0_6 = arith.constant 0 : index
    %c0_7 = arith.constant 0 : index
    %10 = vector.load %arg4[%c0_6, %c0_7] : memref<384x128xbf16, #tpu.memory_space<vmem>>, vector<384x128xbf16>
    %cst_8 = arith.constant dense<0.000000e+00> : vector<8x128xf32>
    %11 = tpu.matmul %9, %10, %cst_8 {dimension_numbers = #tpu.dot_dimension_numbers<[1], [0], [0], [1], [0, 0, 1, 1], [], []>} : vector<8x384xbf16>, vector<384x128xbf16>, vector<8x128xf32> -> vector<8x128xf32>
    %c0_9 = arith.constant 0 : index
    %c0_10 = arith.constant 0 : index
    %12 = vector.load %arg5[%c0_9, %c0_10] : memref<1x128xf32, #tpu.memory_space<vmem>>, vector<1x128xf32>
    %13 = vector.broadcast %12 : vector<1x128xf32> to vector<8x128xf32>
    %14 = arith.addf %11, %13 : vector<8x128xf32>
    %c0_11 = arith.constant 0 : index
    %c0_12 = arith.constant 0 : index
    %15 = vector.load %arg6[%c0_11, %c0_12] : memref<8x128xf32, #tpu.memory_space<vmem>>, vector<8x128xf32>
    tpu.vector_store %arg6[%c0_11, %c0_12], %14 {strides = array<i32>} : memref<8x128xf32, #tpu.memory_space<vmem>>, vector<8x128xf32>,
    return
  }
  func.func @transform_0(%arg0: i32) -> (i32, i32) {
    %c0_i32 = arith.constant 0 : i32
    %c0_i32_0 = arith.constant 0 : i32
    return %arg0, %c0_i32 : i32, i32
  }
  func.func @transform_1(%arg0: i32) -> (i32, i32) {
    %c0_i32 = arith.constant 0 : i32
    %c0_i32_0 = arith.constant 0 : i32
    %c0_i32_1 = arith.constant 0 : i32
    return %c0_i32, %c0_i32_0 : i32, i32
  }
  func.func @transform_2(%arg0: i32) -> (i32, i32) {
    %c0_i32 = arith.constant 0 : i32
    %c0_i32_0 = arith.constant 0 : i32
    %c0_i32_1 = arith.constant 0 : i32
    return %c0_i32, %c0_i32_0 : i32, i32
  }
  func.func @transform_3(%arg0: i32) -> (i32, i32) {
    %c0_i32 = arith.constant 0 : i32
    %c0_i32_0 = arith.constant 0 : i32
    %c0_i32_1 = arith.constant 0 : i32
    return %c0_i32, %c0_i32_0 : i32, i32
  }
  func.func @transform_4(%arg0: i32) -> (i32, i32) {
    %c0_i32 = arith.constant 0 : i32
    %c0_i32_0 = arith.constant 0 : i32
    %c0_i32_1 = arith.constant 0 : i32
    return %c0_i32, %c0_i32_0 : i32, i32
  }
  func.func @transform_5(%arg0: i32) -> (i32, i32) {
    %c0_i32 = arith.constant 0 : i32
    %c0_i32_0 = arith.constant 0 : i32
    return %arg0, %c0_i32 : i32, i32
  }
}

</mosaic_0001>

<bundles_post_ra>
// kernel: wens3_forward.1
= control target key start
LH: loop header
LB: loop body
LE: loop exit
PB: predicated region body
PF: predicated region fallthrough
CT: control target
= control target key end

     0   :  { %10 = vsyncpa [#allocation3], 0  ;;  %s3009_s21 = smov [#allocation2]   ;;  %s3010_s23 = smov 192   ;;  %s3195_s0 = inlined_call_operand.vmem [shape: f32[8,1024], index: 0, kind: input, shape index: {}]   ;;  %s3196_s1 = inlined_call_operand.hbm [shape: bf16[1024,384], index: 1, kind: input, shape index: {}]   ;;  %s3197_s2 = inlined_call_operand.vmem [shape: f32[1,384], index: 2, kind: input, shape index: {}]   ;;  %s3198_s3 = inlined_call_operand.vmem [shape: bf16[384,128], index: 3, kind: input, shape index: {}]   ;;  %s3199_s4 = inlined_call_operand.vmem [shape: f32[1,128], index: 4, kind: input, shape index: {}]   ;;  %s3200_s5 = inlined_call_operand.vmem [shape: f32[8,128], index: 5, kind: output, shape index: {}]  }
   0x1   :  { %s17_s20 = sshll.u32 %s3196_s1, 4  ;;  %s19_s22 = sshll.u32 %s3009_s21, 4  ;;  %s18_s20 = int_to_ptr.hbm [resolvable:$true] %s17_s20  ;;  %s20_s22 = int_to_ptr.vmem [resolvable:$true] %s19_s22 }
   0x2   :  { %s3011_s24 = smov 12  }
   0x3   :  { %25 = dma.hbm_to_vmem [thread:$0]  %s18_s20, 24576, %s20_s22, [#allocation3], %s3010_s23, %s3010_s23, %s3011_s24  }
   0x4   :  { %3007 = dma.done.wait [#allocation3], 24576  }
   0x5   :  { %3008 = vsyncadd [#allocation3], 4294942720  ;;  %v1985_v0 = vld [vmem:[#allocation2 + $0xa8] sm:$0xf]  ;;  %v2785_v1 = vld [vmem:[#allocation2 + $0xb0] sm:$0xf0] }
   0x6   :  { %v2081_v2 = vld [vmem:[#allocation2 + $0x168] sm:$0xf]  ;;  %v1986_v3 = vor.u32 %v2785_v1, %v1985_v0  ;;  %v2809_v4 = vld [vmem:[#allocation2 + $0x170] sm:$0xf0]  ;;  %v1973_v11 = vld [vmem:[#allocation2 + $0x90] sm:$0xf] }
   0x7   :  { %v2177_v5 = vld [vmem:[#allocation2 + $0x228] sm:$0xf]  ;;  %v2833_v6 = vld [vmem:[#allocation2 + $0x230] sm:$0xf0]  ;;  %v2082_v7 = vor.u32 %v2809_v4, %v2081_v2  ;;  %v2782_v13 = vld [vmem:[#allocation2 + $0x98] sm:$0xf0] }
   0x8   :  { %v2178_v8 = vor.u32 %v2833_v6, %v2177_v5  ;;  %v2273_v9 = vld [vmem:[#allocation2 + $0x2e8] sm:$0xf]  ;;  %v2857_v10 = vld [vmem:[#allocation2 + $0x2f0] sm:$0xf0]  ;;  %1340 = vmatpush.bf16.msra.mxu0 %v1986_v3  ;;  %v2069_v14 = vld [vmem:[#allocation2 + $0x150] sm:$0xf]  ;;  %v1974_v16 = vor.u32 %v2782_v13, %v1973_v11 }
   0x9   :  { %v2274_v12 = vor.u32 %v2857_v10, %v2273_v9  ;;  %v2806_v15 = vld [vmem:[#allocation2 + $0x158] sm:$0xf0]  ;;  %1353 = vmatpush.bf16.msra.mxu1 %v2082_v7  ;;  %v2165_v18 = vld [vmem:[#allocation2 + $0x210] sm:$0xf]  ;;  %v1961_v23 = vld [vmem:[#allocation2 + $0x78] sm:$0xf] }
   0xa   :  { %1366 = vmatpush.bf16.msra.mxu2 %v2178_v8  ;;  %v2070_v17 = vor.u32 %v2806_v15, %v2069_v14  ;;  %v2830_v19 = vld [vmem:[#allocation2 + $0x218] sm:$0xf0]  ;;  %v2261_v20 = vld [vmem:[#allocation2 + $0x2d0] sm:$0xf]  ;;  %v2779_v24 = vld [vmem:[#allocation2 + $0x80] sm:$0xf0] }
   0xb   :  { %1379 = vmatpush.bf16.msra.mxu3 %v2274_v12  ;;  %v2166_v21 = vor.u32 %v2830_v19, %v2165_v18  ;;  %v2854_v22 = vld [vmem:[#allocation2 + $0x2d8] sm:$0xf0]  ;;  %v2057_v26 = vld [vmem:[#allocation2 + $0x138] sm:$0xf]  ;;  %v2803_v27 = vld [vmem:[#allocation2 + $0x140] sm:$0xf0]  ;;  %v1962_v29 = vor.u32 %v2779_v24, %v1961_v23 }
   0xc   :  { %v2262_v25 = vor.u32 %v2854_v22, %v2261_v20  ;;  %v2153_v28 = vld [vmem:[#allocation2 + $0x1f8] sm:$0xf]  ;;  %1341 = vmatpush.bf16.msra.mxu0 %v1974_v16  ;;  %v2827_v30 = vld [vmem:[#allocation2 + $0x200] sm:$0xf0]  ;;  %v2058_v33 = vor.u32 %v2803_v27, %v2057_v26  ;;  %v1949_v35 = vld [vmem:[#allocation2 + $0x60] sm:$0xf] }
   0xd   :  { %v2249_v31 = vld [vmem:[#allocation2 + $0x2b8] sm:$0xf]  ;;  %v2851_v32 = vld [vmem:[#allocation2 + $0x2c0] sm:$0xf0]  ;;  %1354 = vmatpush.bf16.msra.mxu1 %v2070_v17  ;;  %v2154_v34 = vor.u32 %v2827_v30, %v2153_v28  ;;  %v2776_v36 = vld [vmem:[#allocation2 + $0x68] sm:$0xf0] }
   0xe   :  { %1367 = vmatpush.bf16.msra.mxu2 %v2166_v21  ;;  %v2045_v37 = vld [vmem:[#allocation2 + $0x120] sm:$0xf]  ;;  %v2250_v38 = vor.u32 %v2851_v32, %v2249_v31  ;;  %v2800_v39 = vld [vmem:[#allocation2 + $0x128] sm:$0xf0]  ;;  %v1950_v44 = vor.u32 %v2776_v36, %v1949_v35  ;;  %v1937_v47 = vld [vmem:[#allocation2 + $0x48] sm:$0xf] }
   0xf   :  { %1380 = vmatpush.bf16.msra.mxu3 %v2262_v25  ;;  %v2141_v40 = vld [vmem:[#allocation2 + $0x1e0] sm:$0xf]  ;;  %v2824_v41 = vld [vmem:[#allocation2 + $0x1e8] sm:$0xf0]  ;;  %v2046_v45 = vor.u32 %v2800_v39, %v2045_v37  ;;  %v2773_v48 = vld [vmem:[#allocation2 + $0x50] sm:$0xf0] }
  0x10   :  { %v2237_v42 = vld [vmem:[#allocation2 + $0x2a0] sm:$0xf]  ;;  %v2848_v43 = vld [vmem:[#allocation2 + $0x2a8] sm:$0xf0]  ;;  %1342 = vmatpush.bf16.msra.mxu0 %v1962_v29  ;;  %v2142_v46 = vor.u32 %v2824_v41, %v2141_v40  ;;  %v2033_v49 = vld [vmem:[#allocation2 + $0x108] sm:$0xf]  ;;  %v1938_v56 = vor.u32 %v2773_v48, %v1937_v47 }
  0x11   :  { %1355 = vmatpush.bf16.msra.mxu1 %v2058_v33  ;;  %v2238_v50 = vor.u32 %v2848_v43, %v2237_v42  ;;  %v2797_v51 = vld [vmem:[#allocation2 + $0x110] sm:$0xf0]  ;;  %v2129_v52 = vld [vmem:[#allocation2 + $0x1c8] sm:$0xf]  ;;  %v1925_v59 = vld [vmem:[#allocation2 + $0x30] sm:$0xf] }
  0x12   :  { %1368 = vmatpush.bf16.msra.mxu2 %v2154_v34  ;;  %v2821_v53 = vld [vmem:[#allocation2 + $0x1d0] sm:$0xf0]  ;;  %v2225_v54 = vld [vmem:[#allocation2 + $0x288] sm:$0xf]  ;;  %v2034_v57 = vor.u32 %v2797_v51, %v2033_v49  ;;  %v2770_v60 = vld [vmem:[#allocation2 + $0x38] sm:$0xf0] }
  0x13   :  { %1381 = vmatpush.bf16.msra.mxu3 %v2250_v38  ;;  %v2845_v55 = vld [vmem:[#allocation2 + $0x290] sm:$0xf0]  ;;  %v2130_v58 = vor.u32 %v2821_v53, %v2129_v52  ;;  %v2021_v61 = vld [vmem:[#allocation2 + $0xf0] sm:$0xf]  ;;  %v2794_v63 = vld [vmem:[#allocation2 + $0xf8] sm:$0xf0]  ;;  %v1926_v4 = vor.u32 %v2770_v60, %v1925_v59 }
  0x14   :  { %1343 = vmatpush.bf16.msra.mxu0 %v1950_v44  ;;  %v2226_v62 = vor.u32 %v2845_v55, %v2225_v54  ;;  %v2117_v0 = vld [vmem:[#allocation2 + $0x1b0] sm:$0xf]  ;;  %v2818_v1 = vld [vmem:[#allocation2 + $0x1b8] sm:$0xf0]  ;;  %v2022_v5 = vor.u32 %v2794_v63, %v2021_v61  ;;  %v1913_v7 = vld [vmem:[#allocation2 + $0x18] sm:$0xf] }
  0x15   :  { %1356 = vmatpush.bf16.msra.mxu1 %v2046_v45  ;;  %v2213_v2 = vld [vmem:[#allocation2 + $0x270] sm:$0xf]  ;;  %v2842_v3 = vld [vmem:[#allocation2 + $0x278] sm:$0xf0]  ;;  %v2118_v6 = vor.u32 %v2818_v1, %v2117_v0  ;;  %v2767_v8 = vld [vmem:[#allocation2 + $0x20] sm:$0xf0] }
  0x16   :  { %1369 = vmatpush.bf16.msra.mxu2 %v2142_v46  ;;  %v2009_v9 = vld [vmem:[#allocation2 + $0xd8] sm:$0xf]  ;;  %v2214_v10 = vor.u32 %v2842_v3, %v2213_v2  ;;  %v2791_v11 = vld [vmem:[#allocation2 + $0xe0] sm:$0xf0]  ;;  %v1914_v16 = vor.u32 %v2767_v8, %v1913_v7  ;;  %v1901_v17 = vld [vmem:[#allocation2] sm:$0xf] }
  0x17   :  { %1382 = vmatpush.bf16.msra.mxu3 %v2238_v50  ;;  %v2105_v12 = vld [vmem:[#allocation2 + $0x198] sm:$0xf]  ;;  %v2815_v13 = vld [vmem:[#allocation2 + $0x1a0] sm:$0xf0]  ;;  %v2764_v18 = vld [vmem:[#allocation2 + $0x8] sm:$0xf0]  ;;  %v2010_v19 = vor.u32 %v2791_v11, %v2009_v9 }
  0x18   :  { %1344 = vmatpush.bf16.msra.mxu0 %v1938_v56  ;;  %v2201_v14 = vld [vmem:[#allocation2 + $0x258] sm:$0xf]  ;;  %v2839_v15 = vld [vmem:[#allocation2 + $0x260] sm:$0xf0]  ;;  %v2106_v20 = vor.u32 %v2815_v13, %v2105_v12  ;;  %v1997_v21 = vld [vmem:[#allocation2 + $0xc0] sm:$0xf]  ;;  %v1902_v31 = vor.u32 %v2764_v18, %v1901_v17 }
  0x19   :  { %1357 = vmatpush.bf16.msra.mxu1 %v2034_v57  ;;  %v2788_v22 = vld [vmem:[#allocation2 + $0xc8] sm:$0xf0]  ;;  %v2093_v23 = vld [vmem:[#allocation2 + $0x180] sm:$0xf]  ;;  %v2202_v24 = vor.u32 %v2839_v15, %v2201_v14  ;;  %v2369_v28 = vld [vmem:[#allocation2 + $0x3a8] sm:$0xf] }
  0x1a   :  { %1370 = vmatpush.bf16.msra.mxu2 %v2130_v58  ;;  %v2812_v25 = vld [vmem:[#allocation2 + $0x188] sm:$0xf0]  ;;  %v2189_v26 = vld [vmem:[#allocation2 + $0x240] sm:$0xf]  ;;  %v2881_v29 = vld [vmem:[#allocation2 + $0x3b0] sm:$0xf0]  ;;  %v1998_v35 = vor.u32 %v2788_v22, %v1997_v21 }
  0x1b   :  { %1383 = vmatpush.bf16.msra.mxu3 %v2226_v62  ;;  %v2836_v27 = vld [vmem:[#allocation2 + $0x248] sm:$0xf0]  ;;  %v2465_v30 = vld [vmem:[#allocation2 + $0x468] sm:$0xf]  ;;  %v2905_v32 = vld [vmem:[#allocation2 + $0x470] sm:$0xf0]  ;;  %v2094_v36 = vor.u32 %v2812_v25, %v2093_v23  ;;  %v2370_v40 = vor.u32 %v2881_v29, %v2369_v28 }
  0x1c   :  { %1345 = vmatpush.bf16.msra.mxu0 %v1926_v4  ;;  %v2561_v33 = vld [vmem:[#allocation2 + $0x528] sm:$0xf]  ;;  %v2929_v34 = vld [vmem:[#allocation2 + $0x530] sm:$0xf0]  ;;  %v2190_v39 = vor.u32 %v2836_v27, %v2189_v26  ;;  %v2466_v41 = vor.u32 %v2905_v32, %v2465_v30  ;;  %v2357_v43 = vld [vmem:[#allocation2 + $0x390] sm:$0xf] }
  0x1d   :  { %1358 = vmatpush.bf16.msra.mxu1 %v2022_v5  ;;  %v2657_v37 = vld [vmem:[#allocation2 + $0x5e8] sm:$0xf]  ;;  %v2953_v38 = vld [vmem:[#allocation2 + $0x5f0] sm:$0xf0]  ;;  %v2562_v42 = vor.u32 %v2929_v34, %v2561_v33  ;;  %v2878_v44 = vld [vmem:[#allocation2 + $0x398] sm:$0xf0] }
  0x1e   :  { %1371 = vmatpush.bf16.msra.mxu2 %v2118_v6  ;;  %v2453_v45 = vld [vmem:[#allocation2 + $0x450] sm:$0xf]  ;;  %v2658_v46 = vor.u32 %v2953_v38, %v2657_v37  ;;  %v2902_v47 = vld [vmem:[#allocation2 + $0x458] sm:$0xf0]  ;;  %v2358_v52 = vor.u32 %v2878_v44, %v2357_v43  ;;  %v2345_v53 = vld [vmem:[#allocation2 + $0x378] sm:$0xf] }
  0x1f   :  { %1384 = vmatpush.bf16.msra.mxu3 %v2214_v10  ;;  %v2549_v48 = vld [vmem:[#allocation2 + $0x510] sm:$0xf]  ;;  %v2926_v49 = vld [vmem:[#allocation2 + $0x518] sm:$0xf0]  ;;  %v2454_v54 = vor.u32 %v2902_v47, %v2453_v45  ;;  %v2875_v56 = vld [vmem:[#allocation2 + $0x380] sm:$0xf0] }
  0x20   :  { %1346 = vmatpush.bf16.msra.mxu0 %v1914_v16  ;;  %v2645_v50 = vld [vmem:[#allocation2 + $0x5d0] sm:$0xf]  ;;  %v2950_v51 = vld [vmem:[#allocation2 + $0x5d8] sm:$0xf0]  ;;  %v2550_v55 = vor.u32 %v2926_v49, %v2549_v48  ;;  %v2441_v57 = vld [vmem:[#allocation2 + $0x438] sm:$0xf]  ;;  %v2346_v2 = vor.u32 %v2875_v56, %v2345_v53 }
  0x21   :  { %1359 = vmatpush.bf16.msra.mxu1 %v2010_v19  ;;  %v38_v58 = vld [vmem:[%s3195_s0 + $0x10] sm:$0xff]  ;;  %v2646_v59 = vor.u32 %v2950_v51, %v2645_v50  ;;  %v2899_v60 = vld [vmem:[#allocation2 + $0x440] sm:$0xf0]  ;;  %v2537_v61 = vld [vmem:[#allocation2 + $0x4f8] sm:$0xf] }
  0x22   :  { %1372 = vmatpush.bf16.msra.mxu2 %v2106_v20  ;;  %v2923_v62 = vld [vmem:[#allocation2 + $0x500] sm:$0xf0]  ;;  %v3048_v63 = vpack.c.bf16 %v38_v58, %v38_v58  ;;  %v2633_v0 = vld [vmem:[#allocation2 + $0x5b8] sm:$0xf]  ;;  %v2333_v3 = vld [vmem:[#allocation2 + $0x360] sm:$0xf]  ;;  %v2442_v6 = vor.u32 %v2899_v60, %v2441_v57 }
  0x23   :  { %1385 = vmatpush.bf16.msra.mxu3 %v2202_v24  ;;  %v2947_v1 = vld [vmem:[#allocation2 + $0x5c0] sm:$0xf0]  ;;  %v2872_v4 = vld [vmem:[#allocation2 + $0x368] sm:$0xf0]  ;;  %v2538_v7 = vor.u32 %v2923_v62, %v2537_v61  ;;  %v2429_v8 = vld [vmem:[#allocation2 + $0x420] sm:$0xf] }
  0x24   :  { %1347 = vmatpush.bf16.msra.mxu0 %v1902_v31  ;;  %v36_v5 = vld [vmem:[%s3195_s0] sm:$0xff]  ;;  %v39_v10 = vld [vmem:[%s3195_s0 + $0x18] sm:$0xff]  ;;  %v37_v11 = vld [vmem:[%s3195_s0 + $0x8] sm:$0xff]  ;;  %v2634_v12 = vor.u32 %v2947_v1, %v2633_v0  ;;  %v2334_v20 = vor.u32 %v2872_v4, %v2333_v3 }
  0x25   :  { %1360 = vmatpush.bf16.msra.mxu1 %v1998_v35  ;;  %v3054_v9 = vpack.c.bf16 %v36_v5, %v36_v5  ;;  %v2896_v13 = vld [vmem:[#allocation2 + $0x428] sm:$0xf0]  ;;  %v2525_v14 = vld [vmem:[#allocation2 + $0x4e0] sm:$0xf]  ;;  %v3062_v16 = vpack.c.bf16 %v39_v10, %v39_v10  ;;  %v3064_v17 = vpack.c.bf16 %v37_v11, %v37_v11  ;;  %v2321_v23 = vld [vmem:[#allocation2 + $0x348] sm:$0xf] }
  0x26   :  { %1373 = vmatpush.bf16.msra.mxu2 %v2094_v36  ;;  %v2920_v15 = vld [vmem:[#allocation2 + $0x4e8] sm:$0xf0]  ;;  %v2621_v18 = vld [vmem:[#allocation2 + $0x5a0] sm:$0xf]  ;;  %v2430_v21 = vor.u32 %v2896_v13, %v2429_v8  ;;  %v2869_v24 = vld [vmem:[#allocation2 + $0x350] sm:$0xf0] }
  0x27   :  { %1386 = vmatpush.bf16.msra.mxu3 %v2190_v39  ;;  %v2944_v19 = vld [vmem:[#allocation2 + $0x5a8] sm:$0xf0]  ;;  %1348 = vmatmul.bf16.vlgmr.msra.gmra.mxu0 %v3054_v9  ;;  %v2526_v22 = vor.u32 %v2920_v15, %v2525_v14  ;;  %v2417_v25 = vld [vmem:[#allocation2 + $0x408] sm:$0xf]  ;;  %v2893_v27 = vld [vmem:[#allocation2 + $0x410] sm:$0xf0]  ;;  %v2322_v32 = vor.u32 %v2869_v24, %v2321_v23 }
  0x28   :  { %1392 = vmatpush.bf16.msrb.mxu0 %v2370_v40  ;;  %v2622_v26 = vor.u32 %v2944_v19, %v2621_v18  ;;  %v2513_v28 = vld [vmem:[#allocation2 + $0x4c8] sm:$0xf]  ;;  %v2917_v29 = vld [vmem:[#allocation2 + $0x4d0] sm:$0xf0]  ;;  %1361 = vmatmul.bf16.vlgmr.msra.gmra.mxu1 %v3064_v17  ;;  %v2418_v33 = vor.u32 %v2893_v27, %v2417_v25  ;;  %v2309_v35 = vld [vmem:[#allocation2 + $0x330] sm:$0xf] }
  0x29   :  { %1405 = vmatpush.bf16.msrb.mxu1 %v2466_v41  ;;  %1374 = vmatmul.bf16.vlgmr.msra.gmra.mxu2 %v3048_v63  ;;  %v2609_v30 = vld [vmem:[#allocation2 + $0x588] sm:$0xf]  ;;  %v2941_v31 = vld [vmem:[#allocation2 + $0x590] sm:$0xf0]  ;;  %v2514_v34 = vor.u32 %v2917_v29, %v2513_v28  ;;  %v2866_v36 = vld [vmem:[#allocation2 + $0x338] sm:$0xf0] }
  0x2a   :  { %1418 = vmatpush.bf16.msrb.mxu2 %v2562_v42  ;;  %1387 = vmatmul.bf16.vlgmr.msra.gmra.mxu3 %v3062_v16  ;;  %v2405_v37 = vld [vmem:[#allocation2 + $0x3f0] sm:$0xf]  ;;  %v2610_v38 = vor.u32 %v2941_v31, %v2609_v30  ;;  %v2890_v39 = vld [vmem:[#allocation2 + $0x3f8] sm:$0xf0]  ;;  %v2310_v44 = vor.u32 %v2866_v36, %v2309_v35  ;;  %v2297_v47 = vld [vmem:[#allocation2 + $0x318] sm:$0xf] }
  0x2b   :  { %1431 = vmatpush.bf16.msrb.mxu3 %v2658_v46  ;;  %v2501_v40 = vld [vmem:[#allocation2 + $0x4b0] sm:$0xf]  ;;  %v2914_v41 = vld [vmem:[#allocation2 + $0x4b8] sm:$0xf0]  ;;  %v2406_v45 = vor.u32 %v2890_v39, %v2405_v37  ;;  %v2863_v48 = vld [vmem:[#allocation2 + $0x320] sm:$0xf0] }
  0x2c   :  { %1393 = vmatpush.bf16.msrb.mxu0 %v2358_v52  ;;  %v2597_v42 = vld [vmem:[#allocation2 + $0x570] sm:$0xf]  ;;  %v2938_v43 = vld [vmem:[#allocation2 + $0x578] sm:$0xf0]  ;;  %v2502_v46 = vor.u32 %v2914_v41, %v2501_v40  ;;  %v2393_v49 = vld [vmem:[#allocation2 + $0x3d8] sm:$0xf]  ;;  %v2298_v56 = vor.u32 %v2863_v48, %v2297_v47 }
  0x2d   :  { %1406 = vmatpush.bf16.msrb.mxu1 %v2454_v54  ;;  %v2598_v50 = vor.u32 %v2938_v43, %v2597_v42  ;;  %v2887_v51 = vld [vmem:[#allocation2 + $0x3e0] sm:$0xf0]  ;;  %v2489_v52 = vld [vmem:[#allocation2 + $0x498] sm:$0xf]  ;;  %v2285_v57 = vld [vmem:[#allocation2 + $0x300] sm:$0xf] }
  0x2e   :  { %1419 = vmatpush.bf16.msrb.mxu2 %v2550_v55  ;;  %v2911_v53 = vld [vmem:[#allocation2 + $0x4a0] sm:$0xf0]  ;;  %v2585_v54 = vld [vmem:[#allocation2 + $0x558] sm:$0xf]  ;;  %v2860_v58 = vld [vmem:[#allocation2 + $0x308] sm:$0xf0] }
  0x2f   :  { %1432 = vmatpush.bf16.msrb.mxu3 %v2646_v59  ;;  %v2935_v55 = vld [vmem:[#allocation2 + $0x560] sm:$0xf0]  ;;  %v2394_v59 = vor.u32 %v2887_v51, %v2393_v49  ;;  %v2490_v60 = vor.u32 %v2911_v53, %v2489_v52  ;;  %v2381_v61 = vld [vmem:[#allocation2 + $0x3c0] sm:$0xf]  ;;  %v2884_v62 = vld [vmem:[#allocation2 + $0x3c8] sm:$0xf0]  ;;  %v2286_v8 = vor.u32 %v2860_v58, %v2285_v57 }
  0x30   :  { %1394 = vmatpush.bf16.msrb.mxu0 %v2346_v2  ;;  %v2477_v0 = vld [vmem:[#allocation2 + $0x480] sm:$0xf]  ;;  %v2586_v1 = vor.u32 %v2935_v55, %v2585_v54  ;;  %v2908_v2 = vld [vmem:[#allocation2 + $0x488] sm:$0xf0]  ;;  %v2083_v10 = vld [vmem:[#allocation2 + $0x174] sm:$0xf0]  ;;  %v2382_v13 = vor.u32 %v2884_v62, %v2381_v61 }
  0x31   :  { %1407 = vmatpush.bf16.msrb.mxu1 %v2442_v6  ;;  %v2573_v3 = vld [vmem:[#allocation2 + $0x540] sm:$0xf]  ;;  %v2932_v4 = vld [vmem:[#allocation2 + $0x548] sm:$0xf0]  ;;  %v1987_v6 = vld [vmem:[#allocation2 + $0xb4] sm:$0xf0]  ;;  %v2478_v14 = vor.u32 %v2908_v2, %v2477_v0 }
  0x32   :  { %1420 = vmatpush.bf16.msrb.mxu2 %v2538_v7  ;;  %v2784_v5 = vld [vmem:[#allocation2 + $0xac] sm:$0xf]  ;;  %v2275_v18 = vld [vmem:[#allocation2 + $0x2f4] sm:$0xf0]  ;;  %v42_v19 = vld [vmem:[%s3195_s0 + $0x30] sm:$0xff] }
  0x33   :  { %1433 = vmatpush.bf16.msrb.mxu3 %v2634_v12  ;;  %v2808_v7 = vld [vmem:[#allocation2 + $0x16c] sm:$0xf]  ;;  %v2179_v12 = vld [vmem:[#allocation2 + $0x234] sm:$0xf0]  ;;  %v40_v23 = vld [vmem:[%s3195_s0 + $0x20] sm:$0xff] }
  0x34   :  { %1395 = vmatpush.bf16.msrb.mxu0 %v2334_v20  ;;  %v2832_v11 = vld [vmem:[#allocation2 + $0x22c] sm:$0xf]  ;;  %v2574_v20 = vor.u32 %v2932_v4, %v2573_v3  ;;  %v43_v24 = vld [vmem:[%s3195_s0 + $0x38] sm:$0xff]  ;;  %v2086_v25 = vor.u32 %v2808_v7, %v2083_v10  ;;  %v1975_v27 = vld [vmem:[#allocation2 + $0x9c] sm:$0xf0]  ;;  %v3083_v37 = vpack.c.bf16 %v40_v23, %v40_v23 }
  0x35   :  { %1408 = vmatpush.bf16.msrb.mxu1 %v2430_v21  ;;  %v2856_v15 = vld [vmem:[#allocation2 + $0x2ec] sm:$0xf]  ;;  %v1990_v21 = vor.u32 %v2784_v5, %v1987_v6  ;;  %v2805_v28 = vld [vmem:[#allocation2 + $0x154] sm:$0xf]  ;;  %v2071_v31 = vld [vmem:[#allocation2 + $0x15c] sm:$0xf0] }
  0x36   :  { %1421 = vmatpush.bf16.msrb.mxu2 %v2526_v22  ;;  %v2781_v22 = vld [vmem:[#allocation2 + $0x94] sm:$0xf]  ;;  %v41_v29 = vld [vmem:[%s3195_s0 + $0x28] sm:$0xff]  ;;  %v2278_v30 = vor.u32 %v2856_v15, %v2275_v18  ;;  %v2263_v36 = vld [vmem:[#allocation2 + $0x2dc] sm:$0xf0]  ;;  %v2074_v41 = vor.u32 %v2805_v28, %v2071_v31 }
  0x37   :  { %1434 = vmatpush.bf16.msrb.mxu3 %v2622_v26  ;;  %v2182_v26 = vor.u32 %v2832_v11, %v2179_v12  ;;  %v2853_v35 = vld [vmem:[#allocation2 + $0x2d4] sm:$0xf]  ;;  %v1978_v39 = vor.u32 %v2781_v22, %v1975_v27  ;;  %v3087_v40 = vpack.c.bf16 %v41_v29, %v41_v29  ;;  %v2778_v43 = vld [vmem:[#allocation2 + $0x7c] sm:$0xf]  ;;  %v2059_v47 = vld [vmem:[#allocation2 + $0x144] sm:$0xf0] }
  0x38   :  { %1396 = vmatpush.bf16.msrb.mxu0 %v2322_v32  ;;  %v2829_v32 = vld [vmem:[#allocation2 + $0x214] sm:$0xf]  ;;  %v2826_v48 = vld [vmem:[#allocation2 + $0x1fc] sm:$0xf]  ;;  %v2155_v49 = vld [vmem:[#allocation2 + $0x204] sm:$0xf0] }
  0x39   :  { %1409 = vmatpush.bf16.msrb.mxu1 %v2418_v33  ;;  %v2167_v33 = vld [vmem:[#allocation2 + $0x21c] sm:$0xf0]  ;;  %v2251_v51 = vld [vmem:[#allocation2 + $0x2c4] sm:$0xf0]  ;;  %v2158_v54 = vor.u32 %v2826_v48, %v2155_v49  ;;  %v2775_v55 = vld [vmem:[#allocation2 + $0x64] sm:$0xf] }
  0x3a   :  { %1422 = vmatpush.bf16.msrb.mxu2 %v2514_v34  ;;  %v3081_v34 = vpack.c.bf16 %v42_v19, %v42_v19  ;;  %v2170_v42 = vor.u32 %v2829_v32, %v2167_v33  ;;  %v2799_v57 = vld [vmem:[#allocation2 + $0x124] sm:$0xf]  ;;  %v2143_v61 = vld [vmem:[#allocation2 + $0x1ec] sm:$0xf0]  ;;  %v2772_v4 = vld [vmem:[#allocation2 + $0x4c] sm:$0xf] }
  0x3b   :  { %1435 = vmatpush.bf16.msrb.mxu3 %v2610_v38  ;;  %v3085_v38 = vpack.c.bf16 %v43_v24, %v43_v24  ;;  %v2847_v62 = vld [vmem:[#allocation2 + $0x2a4] sm:$0xf]  ;;  %v2239_v0 = vld [vmem:[#allocation2 + $0x2ac] sm:$0xf0]  ;;  %v1939_v5 = vld [vmem:[#allocation2 + $0x54] sm:$0xf0] }
  0x3c   :  { %1397 = vmatpush.bf16.msrb.mxu0 %v2310_v44  ;;  %v1963_v44 = vld [vmem:[#allocation2 + $0x84] sm:$0xf0]  ;;  %v2796_v6 = vld [vmem:[#allocation2 + $0x10c] sm:$0xf]  ;;  %v2242_v7 = vor.u32 %v2847_v62, %v2239_v0  ;;  %v2131_v11 = vld [vmem:[#allocation2 + $0x1d4] sm:$0xf0] }
  0x3d   :  { %1410 = vmatpush.bf16.msrb.mxu1 %v2406_v45  ;;  %v2802_v45 = vld [vmem:[#allocation2 + $0x13c] sm:$0xf]  ;;  %v1966_v52 = vor.u32 %v2778_v43, %v1963_v44  ;;  %v2820_v10 = vld [vmem:[#allocation2 + $0x1cc] sm:$0xf]  ;;  %v2769_v19 = vld [vmem:[#allocation2 + $0x34] sm:$0xf] }
  0x3e   :  { %1423 = vmatpush.bf16.msrb.mxu2 %v2502_v46  ;;  %v2266_v46 = vor.u32 %v2853_v35, %v2263_v36  ;;  %v2062_v53 = vor.u32 %v2802_v45, %v2059_v47  ;;  %v2844_v12 = vld [vmem:[#allocation2 + $0x28c] sm:$0xf]  ;;  %v2134_v18 = vor.u32 %v2820_v10, %v2131_v11  ;;  %v2023_v23 = vld [vmem:[#allocation2 + $0xfc] sm:$0xf0]  ;;  %v2817_v24 = vld [vmem:[#allocation2 + $0x1b4] sm:$0xf] }
  0x3f   :  { %1436 = vmatpush.bf16.msrb.mxu3 %v2598_v50  ;;  %v2850_v50 = vld [vmem:[#allocation2 + $0x2bc] sm:$0xf]  ;;  %v2215_v27 = vld [vmem:[#allocation2 + $0x27c] sm:$0xf0]  ;;  %v1915_v32 = vld [vmem:[#allocation2 + $0x24] sm:$0xf0] }
  0x40   :  { %1398 = vmatpush.bf16.msrb.mxu0 %v2298_v56  ;;  %v1951_v56 = vld [vmem:[#allocation2 + $0x6c] sm:$0xf0]  ;;  %v2254_v58 = vor.u32 %v2850_v50, %v2251_v51  ;;  %v2766_v31 = vld [vmem:[#allocation2 + $0x1c] sm:$0xf]  ;;  %v2011_v36 = vld [vmem:[#allocation2 + $0xe4] sm:$0xf0] }
  0x41   :  { %1411 = vmatpush.bf16.msrb.mxu1 %v2394_v59  ;;  %v2047_v59 = vld [vmem:[#allocation2 + $0x12c] sm:$0xf0]  ;;  %v2790_v33 = vld [vmem:[#allocation2 + $0xdc] sm:$0xf]  ;;  %v2203_v43 = vld [vmem:[#allocation2 + $0x264] sm:$0xf0]  ;;  %v1918_v44 = vor.u32 %v2766_v31, %v1915_v32 }
  0x42   :  { %1424 = vmatpush.bf16.msrb.mxu2 %v2490_v60  ;;  %v2823_v60 = vld [vmem:[#allocation2 + $0x1e4] sm:$0xf]  ;;  %v2050_v2 = vor.u32 %v2799_v57, %v2047_v59  ;;  %v2014_v47 = vor.u32 %v2790_v33, %v2011_v36  ;;  %v1999_v50 = vld [vmem:[#allocation2 + $0xcc] sm:$0xf0]  ;;  %v2371_v57 = vld [vmem:[#allocation2 + $0x3b4] sm:$0xf0] }
  0x43   :  { %1437 = vmatpush.bf16.msrb.mxu3 %v2586_v1  ;;  %v1954_v1 = vor.u32 %v2775_v55, %v1951_v56  ;;  %v2146_v3 = vor.u32 %v2823_v60, %v2143_v61  ;;  %v2763_v45 = vld [vmem:[#allocation2 + $0x4] sm:$0xf]  ;;  %v2191_v55 = vld [vmem:[#allocation2 + $0x24c] sm:$0xf0]  ;;  %v2880_v56 = vld [vmem:[#allocation2 + $0x3ac] sm:$0xf] }
  0x44   :  { %1399 = vmatpush.bf16.msrb.mxu0 %v2286_v8  ;;  %v2035_v8 = vld [vmem:[#allocation2 + $0x114] sm:$0xf0]  ;;  %v2787_v49 = vld [vmem:[#allocation2 + $0xc4] sm:$0xf]  ;;  %v2928_v61 = vld [vmem:[#allocation2 + $0x52c] sm:$0xf] }
  0x45   :  { %1412 = vmatpush.bf16.msrb.mxu1 %v2382_v13  ;;  %v2227_v13 = vld [vmem:[#allocation2 + $0x294] sm:$0xf0]  ;;  %v2038_v15 = vor.u32 %v2796_v6, %v2035_v8  ;;  %v2811_v51 = vld [vmem:[#allocation2 + $0x184] sm:$0xf]  ;;  %v2002_v0 = vor.u32 %v2787_v49, %v1999_v50  ;;  %v2877_v8 = vld [vmem:[#allocation2 + $0x394] sm:$0xf] }
  0x46   :  { %1425 = vmatpush.bf16.msrb.mxu2 %v2478_v14  ;;  %v1942_v14 = vor.u32 %v2772_v4, %v1939_v5  ;;  %v2230_v22 = vor.u32 %v2844_v12, %v2227_v13  ;;  %v2467_v60 = vld [vmem:[#allocation2 + $0x474] sm:$0xf0]  ;;  %v2374_v5 = vor.u32 %v2880_v56, %v2371_v57  ;;  %v2359_v10 = vld [vmem:[#allocation2 + $0x39c] sm:$0xf0]  ;;  %v2901_v11 = vld [vmem:[#allocation2 + $0x454] sm:$0xf] }
  0x47   :  { %1438 = vmatpush.bf16.msrb.mxu3 %v2574_v20  ;;  %1400 = vmatmul.bf16.vlgmr.msrb.gmra.mxu0 %v3083_v37  ;;  %v1927_v20 = vld [vmem:[#allocation2 + $0x3c] sm:$0xf0]  ;;  %v2563_v62 = vld [vmem:[#allocation2 + $0x534] sm:$0xf0]  ;;  %v2635_v31 = vld [vmem:[#allocation2 + $0x5c4] sm:$0xf0] }
  0x48   :  { %1444 = vmatpush.bf16.msra.mxu0 %v1990_v21  ;;  %1413 = vmatmul.bf16.vlgmr.msrb.gmra.mxu1 %v3087_v40  ;;  %v2793_v21 = vld [vmem:[#allocation2 + $0xf4] sm:$0xf]  ;;  %v1930_v28 = vor.u32 %v2769_v19, %v1927_v20  ;;  %v2455_v13 = vld [vmem:[#allocation2 + $0x45c] sm:$0xf0]  ;;  %v2362_v20 = vor.u32 %v2877_v8, %v2359_v10  ;;  %v2871_v36 = vld [vmem:[#allocation2 + $0x364] sm:$0xf] }
  0x49   :  { %1457 = vmatpush.bf16.msra.mxu1 %v2086_v25  ;;  %1426 = vmatmul.bf16.vlgmr.msrb.gmra.mxu2 %v3081_v34  ;;  %v2119_v25 = vld [vmem:[#allocation2 + $0x1bc] sm:$0xf0]  ;;  %v2026_v29 = vor.u32 %v2793_v21, %v2023_v23  ;;  %v2458_v21 = vor.u32 %v2901_v11, %v2455_v13  ;;  %v2874_v23 = vld [vmem:[#allocation2 + $0x37c] sm:$0xf]  ;;  %v2916_v56 = vld [vmem:[#allocation2 + $0x4cc] sm:$0xf] }
  0x4a   :  { %1470 = vmatpush.bf16.msra.mxu2 %v2182_v26  ;;  %1439 = vmatmul.bf16.vlgmr.msrb.gmra.mxu3 %v3085_v38  ;;  %v2841_v26 = vld [vmem:[#allocation2 + $0x274] sm:$0xf]  ;;  %v2647_v19 = vld [vmem:[#allocation2 + $0x5dc] sm:$0xf0]  ;;  %v2515_v57 = vld [vmem:[#allocation2 + $0x4d4] sm:$0xf0] }
  0x4b   :  { %1483 = vmatpush.bf16.msra.mxu3 %v2278_v30  ;;  %v2122_v30 = vor.u32 %v2817_v24, %v2119_v25  ;;  %v2218_v35 = vor.u32 %v2841_v26, %v2215_v27  ;;  %v2347_v24 = vld [vmem:[#allocation2 + $0x384] sm:$0xf0]  ;;  %v2898_v25 = vld [vmem:[#allocation2 + $0x43c] sm:$0xf]  ;;  %v2599_v8 = vld [vmem:[#allocation2 + $0x57c] sm:$0xf0] }
  0x4c   :  { %1445 = vmatpush.bf16.msra.mxu0 %v1978_v39  ;;  %v2814_v39 = vld [vmem:[#allocation2 + $0x19c] sm:$0xf]  ;;  %v2443_v27 = vld [vmem:[#allocation2 + $0x444] sm:$0xf0]  ;;  %v2350_v32 = vor.u32 %v2874_v23, %v2347_v24 }
  0x4d   :  { %1458 = vmatpush.bf16.msra.mxu1 %v2074_v41  ;;  %v2107_v41 = vld [vmem:[#allocation2 + $0x1a4] sm:$0xf0]  ;;  %v2446_v33 = vor.u32 %v2898_v25, %v2443_v27  ;;  %v2862_v13 = vld [vmem:[#allocation2 + $0x31c] sm:$0xf]  ;;  %v2859_v25 = vld [vmem:[#allocation2 + $0x304] sm:$0xf] }
  0x4e   :  { %1471 = vmatpush.bf16.msra.mxu2 %v2170_v42  ;;  %v2838_v42 = vld [vmem:[#allocation2 + $0x25c] sm:$0xf]  ;;  %v2110_v48 = vor.u32 %v2814_v39, %v2107_v41  ;;  %v2335_v39 = vld [vmem:[#allocation2 + $0x36c] sm:$0xf0]  ;;  %v2895_v41 = vld [vmem:[#allocation2 + $0x424] sm:$0xf] }
  0x4f   :  { %1484 = vmatpush.bf16.msra.mxu3 %v2266_v46  ;;  %v1903_v46 = vld [vmem:[#allocation2 + $0xc] sm:$0xf0]  ;;  %v2587_v23 = vld [vmem:[#allocation2 + $0x564] sm:$0xf0] }
  0x50   :  { %1446 = vmatpush.bf16.msra.mxu0 %v1966_v52  ;;  %v2206_v52 = vor.u32 %v2838_v42, %v2203_v43  ;;  %v1906_v59 = vor.u32 %v2763_v45, %v1903_v46  ;;  %v2431_v43 = vld [vmem:[#allocation2 + $0x42c] sm:$0xf0]  ;;  %v2943_v46 = vld [vmem:[#allocation2 + $0x5a4] sm:$0xf] }
  0x51   :  { %1459 = vmatpush.bf16.msra.mxu1 %v2062_v53  ;;  %v2095_v53 = vld [vmem:[#allocation2 + $0x18c] sm:$0xf0]  ;;  %v2434_v49 = vor.u32 %v2895_v41, %v2431_v43  ;;  %v2786_v41 = vld [vmem:[#allocation2 + $0xb8] sm:$0xf0] }
  0x52   :  { %1472 = vmatpush.bf16.msra.mxu2 %v2158_v54  ;;  %v2835_v54 = vld [vmem:[#allocation2 + $0x244] sm:$0xf]  ;;  %v2527_v45 = vld [vmem:[#allocation2 + $0x4ec] sm:$0xf0] }
  0x53   :  { %1485 = vmatpush.bf16.msra.mxu3 %v2254_v58  ;;  %v2904_v58 = vld [vmem:[#allocation2 + $0x46c] sm:$0xf]  ;;  %v2194_v4 = vor.u32 %v2835_v54, %v2191_v55  ;;  %v2419_v55 = vld [vmem:[#allocation2 + $0x414] sm:$0xf0] }
  0x54   :  { %1447 = vmatpush.bf16.msra.mxu0 %v1954_v1  ;;  %v2098_v1 = vor.u32 %v2811_v51, %v2095_v53  ;;  %v2470_v6 = vor.u32 %v2904_v58, %v2467_v60  ;;  %v2868_v51 = vld [vmem:[#allocation2 + $0x34c] sm:$0xf] }
  0x55   :  { %1460 = vmatpush.bf16.msra.mxu1 %v2050_v2  ;;  %v2952_v2 = vld [vmem:[#allocation2 + $0x5ec] sm:$0xf] }
  0x56   :  { %1473 = vmatpush.bf16.msra.mxu2 %v2146_v3  ;;  %v2659_v3 = vld [vmem:[#allocation2 + $0x5f4] sm:$0xf0]  ;;  %v2892_v53 = vld [vmem:[#allocation2 + $0x40c] sm:$0xf] }
  0x57   :  { %1486 = vmatpush.bf16.msra.mxu3 %v2242_v7  ;;  %v2566_v7 = vor.u32 %v2928_v61, %v2563_v62  ;;  %v2662_v12 = vor.u32 %v2952_v2, %v2659_v3  ;;  %v2940_v58 = vld [vmem:[#allocation2 + $0x58c] sm:$0xf]  ;;  %v2422_v61 = vor.u32 %v2892_v53, %v2419_v55  ;;  %v2518_v62 = vor.u32 %v2916_v56, %v2515_v57  ;;  %v2889_v2 = vld [vmem:[#allocation2 + $0x3f4] sm:$0xf]  ;;  %v1981_v55 = vld [vmem:[#allocation2 + $0x98] sm:$0xf] }
  0x58   :  { %1448 = vmatpush.bf16.msra.mxu0 %v1942_v14  ;;  %v2925_v14 = vld [vmem:[#allocation2 + $0x514] sm:$0xf]  ;;  %v2783_v56 = vld [vmem:[#allocation2 + $0xa0] sm:$0xf0]  ;;  %v2077_v57 = vld [vmem:[#allocation2 + $0x158] sm:$0xf] }
  0x59   :  { %1461 = vmatpush.bf16.msra.mxu1 %v2038_v15  ;;  %v2551_v15 = vld [vmem:[#allocation2 + $0x51c] sm:$0xf0] }
  0x5a   :  { %1474 = vmatpush.bf16.msra.mxu2 %v2134_v18  ;;  %v2949_v18 = vld [vmem:[#allocation2 + $0x5d4] sm:$0xf] }
  0x5b   :  { %1487 = vmatpush.bf16.msra.mxu3 %v2230_v22  ;;  %v2554_v22 = vor.u32 %v2925_v14, %v2551_v15  ;;  %v2650_v26 = vor.u32 %v2949_v18, %v2647_v19  ;;  %v2299_v14 = vld [vmem:[#allocation2 + $0x324] sm:$0xf0]  ;;  %v2886_v15 = vld [vmem:[#allocation2 + $0x3dc] sm:$0xf] }
  0x5c   :  { %1449 = vmatpush.bf16.msra.mxu0 %v1930_v28  ;;  %v2922_v28 = vld [vmem:[#allocation2 + $0x4fc] sm:$0xf]  ;;  %v2395_v19 = vld [vmem:[#allocation2 + $0x3e4] sm:$0xf0]  ;;  %v2302_v24 = vor.u32 %v2862_v13, %v2299_v14  ;;  %v2852_v13 = vld [vmem:[#allocation2 + $0x2c8] sm:$0xf0] }
  0x5d   :  { %1462 = vmatpush.bf16.msra.mxu1 %v2026_v29  ;;  %v2539_v29 = vld [vmem:[#allocation2 + $0x504] sm:$0xf0]  ;;  %v2398_v27 = vor.u32 %v2886_v15, %v2395_v19 }
  0x5e   :  { %1475 = vmatpush.bf16.msra.mxu2 %v2122_v30  ;;  %v2946_v30 = vld [vmem:[#allocation2 + $0x5bc] sm:$0xf]  ;;  %v1957_v19 = vld [vmem:[#allocation2 + $0x68] sm:$0xf] }
  0x5f   :  { %1488 = vmatpush.bf16.msra.mxu3 %v2218_v35  ;;  %v2542_v35 = vor.u32 %v2922_v28, %v2539_v29  ;;  %v2638_v42 = vor.u32 %v2946_v30, %v2635_v31  ;;  %v2883_v29 = vld [vmem:[#allocation2 + $0x3c4] sm:$0xf]  ;;  %v2383_v30 = vld [vmem:[#allocation2 + $0x3cc] sm:$0xf0] }
  0x60   :  { %1450 = vmatpush.bf16.msra.mxu0 %v1918_v44  ;;  %v2919_v44 = vld [vmem:[#allocation2 + $0x4e4] sm:$0xf] }
  0x61   :  { %1463 = vmatpush.bf16.msra.mxu1 %v2014_v47  ;;  %v2623_v47 = vld [vmem:[#allocation2 + $0x5ac] sm:$0xf0]  ;;  %v2530_v50 = vor.u32 %v2919_v44, %v2527_v45  ;;  %v2907_v31 = vld [vmem:[#allocation2 + $0x484] sm:$0xf]  ;;  %v2810_v44 = vld [vmem:[#allocation2 + $0x178] sm:$0xf0] }
  0x62   :  { %1476 = vmatpush.bf16.msra.mxu2 %v2110_v48  ;;  %v2338_v48 = vor.u32 %v2871_v36, %v2335_v39  ;;  %v2626_v54 = vor.u32 %v2943_v46, %v2623_v47  ;;  %v2575_v36 = vld [vmem:[#allocation2 + $0x54c] sm:$0xf0]  ;;  %v2834_v46 = vld [vmem:[#allocation2 + $0x238] sm:$0xf0]  ;;  %v2386_v47 = vor.u32 %v2883_v29, %v2383_v30 }
  0x63   :  { %1489 = vmatpush.bf16.msra.mxu3 %v2206_v52  ;;  %v2323_v52 = vld [vmem:[#allocation2 + $0x354] sm:$0xf0]  ;;  %v1993_v39 = vld [vmem:[#allocation2 + $0xb0] sm:$0xf] }
  0x64   :  { %1451 = vmatpush.bf16.msra.mxu0 %v1906_v59  ;;  %v2611_v59 = vld [vmem:[#allocation2 + $0x594] sm:$0xf0]  ;;  %v2326_v60 = vor.u32 %v2868_v51, %v2323_v52  ;;  %v2185_v45 = vld [vmem:[#allocation2 + $0x230] sm:$0xf]  ;;  %v1994_v52 = vor.u32 %v2786_v41, %v1993_v39  ;;  %v2822_v41 = vld [vmem:[#allocation2 + $0x1d8] sm:$0xf0] }
  0x65   :  { %1464 = vmatpush.bf16.msra.mxu1 %v2002_v0  ;;  %v2865_v0 = vld [vmem:[#allocation2 + $0x334] sm:$0xf]  ;;  %v2614_v3 = vor.u32 %v2940_v58, %v2611_v59  ;;  %v2807_v59 = vld [vmem:[#allocation2 + $0x160] sm:$0xf0]  ;;  %v2137_v39 = vld [vmem:[#allocation2 + $0x1d0] sm:$0xf] }
  0x66   :  { %1477 = vmatpush.bf16.msra.mxu2 %v2098_v1  ;;  %v2311_v1 = vld [vmem:[#allocation2 + $0x33c] sm:$0xf0] }
  0x67   :  { %1490 = vmatpush.bf16.msra.mxu3 %v2194_v4  ;;  %1452 = vmatmul.bf16.vlgmr.msra.gmra.mxu0 %v3054_v9  ;;  %v2407_v4 = vld [vmem:[#allocation2 + $0x3fc] sm:$0xf0]  ;;  %v2314_v10 = vor.u32 %v2865_v0, %v2311_v1  ;;  %v2855_v0 = vld [vmem:[#allocation2 + $0x2e0] sm:$0xf0]  ;;  %v1982_v1 = vor.u32 %v2783_v56, %v1981_v55 }
  0x68   :  { %1496 = vmatpush.bf16.msrb.mxu0 %v2374_v5  ;;  %1465 = vmatmul.bf16.vlgmr.msra.gmra.mxu1 %v3064_v17  ;;  %v2913_v5 = vld [vmem:[#allocation2 + $0x4b4] sm:$0xf]  ;;  %v2410_v11 = vor.u32 %v2889_v2, %v2407_v4  ;;  %v2078_v2 = vor.u32 %v2807_v59, %v2077_v57  ;;  %v1969_v4 = vld [vmem:[#allocation2 + $0x80] sm:$0xf]  ;;  %v2843_v55 = vld [vmem:[#allocation2 + $0x280] sm:$0xf0] }
  0x69   :  { %1509 = vmatpush.bf16.msrb.mxu1 %v2470_v6  ;;  %1478 = vmatmul.bf16.vlgmr.msra.gmra.mxu2 %v3048_v63  ;;  %v2503_v6 = vld [vmem:[#allocation2 + $0x4bc] sm:$0xf0] }
  0x6a   :  { %1522 = vmatpush.bf16.msrb.mxu2 %v2566_v7  ;;  %1491 = vmatmul.bf16.vlgmr.msra.gmra.mxu3 %v3062_v16  ;;  %v2937_v7 = vld [vmem:[#allocation2 + $0x574] sm:$0xf]  ;;  %v1921_v59 = vld [vmem:[#allocation2 + $0x20] sm:$0xf] }
  0x6b   :  { %1535 = vmatpush.bf16.msrb.mxu3 %v2662_v12  ;;  %v2506_v12 = vor.u32 %v2913_v5, %v2503_v6  ;;  %v2602_v18 = vor.u32 %v2937_v7, %v2599_v8  ;;  %v2780_v5 = vld [vmem:[#allocation2 + $0x88] sm:$0xf0]  ;;  %v2065_v6 = vld [vmem:[#allocation2 + $0x140] sm:$0xf] }
  0x6c   :  { %1497 = vmatpush.bf16.msrb.mxu0 %v2362_v20  ;;  %v2910_v20 = vld [vmem:[#allocation2 + $0x49c] sm:$0xf]  ;;  %v2804_v8 = vld [vmem:[#allocation2 + $0x148] sm:$0xf0]  ;;  %v1970_v14 = vor.u32 %v2780_v5, %v1969_v4 }
  0x6d   :  { %1510 = vmatpush.bf16.msrb.mxu1 %v2458_v21  ;;  %v2491_v21 = vld [vmem:[#allocation2 + $0x4a4] sm:$0xf0]  ;;  %v2066_v15 = vor.u32 %v2804_v8, %v2065_v6  ;;  %v2840_v4 = vld [vmem:[#allocation2 + $0x268] sm:$0xf0] }
  0x6e   :  { %1523 = vmatpush.bf16.msrb.mxu2 %v2554_v22  ;;  %v2934_v22 = vld [vmem:[#allocation2 + $0x55c] sm:$0xf]  ;;  %v2494_v28 = vor.u32 %v2910_v20, %v2491_v21  ;;  %v2777_v20 = vld [vmem:[#allocation2 + $0x70] sm:$0xf0]  ;;  %v2053_v21 = vld [vmem:[#allocation2 + $0x128] sm:$0xf] }
  0x6f   :  { %1536 = vmatpush.bf16.msrb.mxu3 %v2650_v26  ;;  %v2287_v26 = vld [vmem:[#allocation2 + $0x30c] sm:$0xf0]  ;;  %v1909_v6 = vld [vmem:[#allocation2 + $0x8] sm:$0xf] }
  0x70   :  { %1498 = vmatpush.bf16.msrb.mxu0 %v2350_v32  ;;  %v2590_v32 = vor.u32 %v2934_v22, %v2587_v23  ;;  %v2290_v43 = vor.u32 %v2859_v25, %v2287_v26  ;;  %v2801_v23 = vld [vmem:[#allocation2 + $0x130] sm:$0xf0]  ;;  %v2245_v26 = vld [vmem:[#allocation2 + $0x2a8] sm:$0xf] }
  0x71   :  { %1511 = vmatpush.bf16.msrb.mxu1 %v2446_v33  ;;  %v2479_v33 = vld [vmem:[#allocation2 + $0x48c] sm:$0xf0]  ;;  %v2825_v25 = vld [vmem:[#allocation2 + $0x1f0] sm:$0xf0]  ;;  %v2054_v29 = vor.u32 %v2801_v23, %v2053_v21  ;;  %v2882_v21 = vld [vmem:[#allocation2 + $0x3b8] sm:$0xf0] }
  0x72   :  { %1524 = vmatpush.bf16.msrb.mxu2 %v2542_v35  ;;  %v2931_v35 = vld [vmem:[#allocation2 + $0x544] sm:$0xf] }
  0x73   :  { %1537 = vmatpush.bf16.msrb.mxu3 %v2638_v42  ;;  %v2089_v42 = vld [vmem:[#allocation2 + $0x170] sm:$0xf]  ;;  %v2578_v51 = vor.u32 %v2931_v35, %v2575_v36  ;;  %v2798_v36 = vld [vmem:[#allocation2 + $0x118] sm:$0xf0] }
  0x74   :  { %1499 = vmatpush.bf16.msrb.mxu0 %v2338_v48  ;;  %v2482_v48 = vor.u32 %v2907_v31, %v2479_v33  ;;  %v2090_v53 = vor.u32 %v2810_v44, %v2089_v42  ;;  %v1945_v31 = vld [vmem:[#allocation2 + $0x50] sm:$0xf] }
  0x75   :  { %1512 = vmatpush.bf16.msrb.mxu1 %v2434_v49  ;;  %v2281_v49 = vld [vmem:[#allocation2 + $0x2f0] sm:$0xf] }
  0x76   :  { %1525 = vmatpush.bf16.msrb.mxu2 %v2530_v50  ;;  %v2858_v50 = vld [vmem:[#allocation2 + $0x2f8] sm:$0xf0]  ;;  %v2041_v33 = vld [vmem:[#allocation2 + $0x110] sm:$0xf] }
  0x77   :  { %1538 = vmatpush.bf16.msrb.mxu3 %v2626_v54  ;;  %v2186_v54 = vor.u32 %v2834_v46, %v2185_v45  ;;  %v2282_v58 = vor.u32 %v2858_v50, %v2281_v49  ;;  %v2233_v42 = vld [vmem:[#allocation2 + $0x290] sm:$0xf]  ;;  %v2042_v45 = vor.u32 %v2798_v36, %v2041_v33  ;;  %v2138_v46 = vor.u32 %v2822_v41, %v2137_v39  ;;  %v2029_v49 = vld [vmem:[#allocation2 + $0xf8] sm:$0xf]  ;;  %v2879_v39 = vld [vmem:[#allocation2 + $0x3a0] sm:$0xf0] }
  0x78   :  { %1500 = vmatpush.bf16.msrb.mxu0 %v2326_v60  ;;  %v2173_v60 = vld [vmem:[#allocation2 + $0x218] sm:$0xf] }
  0x79   :  { %1513 = vmatpush.bf16.msrb.mxu1 %v2422_v61  ;;  %v2831_v61 = vld [vmem:[#allocation2 + $0x220] sm:$0xf0]  ;;  %v2365_v36 = vld [vmem:[#allocation2 + $0x398] sm:$0xf] }
  0x7a   :  { %1526 = vmatpush.bf16.msrb.mxu2 %v2518_v62  ;;  %v2269_v62 = vld [vmem:[#allocation2 + $0x2d8] sm:$0xf] }
  0x7b   :  { %1539 = vmatpush.bf16.msrb.mxu3 %v2614_v3  ;;  %v2174_v3 = vor.u32 %v2831_v61, %v2173_v60  ;;  %v2270_v7 = vor.u32 %v2855_v0, %v2269_v62  ;;  %v2768_v60 = vld [vmem:[#allocation2 + $0x28] sm:$0xf0]  ;;  %v2017_v61 = vld [vmem:[#allocation2 + $0xe0] sm:$0xf]  ;;  %v2461_v41 = vld [vmem:[#allocation2 + $0x458] sm:$0xf] }
  0x7c   :  { %1501 = vmatpush.bf16.msrb.mxu0 %v2314_v10  ;;  %v2161_v10 = vld [vmem:[#allocation2 + $0x200] sm:$0xf]  ;;  %v2792_v0 = vld [vmem:[#allocation2 + $0xe8] sm:$0xf0]  ;;  %v1922_v5 = vor.u32 %v2768_v60, %v1921_v59 }
  0x7d   :  { %1514 = vmatpush.bf16.msrb.mxu1 %v2410_v11  ;;  %v2828_v11 = vld [vmem:[#allocation2 + $0x208] sm:$0xf0]  ;;  %v2018_v8 = vor.u32 %v2792_v0, %v2017_v61  ;;  %v2341_v0 = vld [vmem:[#allocation2 + $0x368] sm:$0xf] }
  0x7e   :  { %1527 = vmatpush.bf16.msrb.mxu2 %v2506_v12  ;;  %v2257_v12 = vld [vmem:[#allocation2 + $0x2c0] sm:$0xf]  ;;  %v2948_v59 = vld [vmem:[#allocation2 + $0x5c8] sm:$0xf0] }
  0x7f   :  { %1540 = vmatpush.bf16.msrb.mxu3 %v2602_v18  ;;  %v2162_v18 = vor.u32 %v2828_v11, %v2161_v10  ;;  %v2258_v22 = vor.u32 %v2852_v13, %v2257_v12  ;;  %v2005_v11 = vld [vmem:[#allocation2 + $0xc8] sm:$0xf]  ;;  %v2789_v12 = vld [vmem:[#allocation2 + $0xd0] sm:$0xf0] }
  0x80   :  { %1502 = vmatpush.bf16.msrb.mxu0 %v2302_v24  ;;  %v2149_v24 = vld [vmem:[#allocation2 + $0x1e8] sm:$0xf] }
  0x81   :  { %1515 = vmatpush.bf16.msrb.mxu1 %v2398_v27  ;;  %v2849_v27 = vld [vmem:[#allocation2 + $0x2b0] sm:$0xf0]  ;;  %v2150_v30 = vor.u32 %v2825_v25, %v2149_v24  ;;  %v2101_v13 = vld [vmem:[#allocation2 + $0x188] sm:$0xf]  ;;  %v2906_v24 = vld [vmem:[#allocation2 + $0x478] sm:$0xf0] }
  0x82   :  { %1528 = vmatpush.bf16.msrb.mxu2 %v2494_v28  ;;  %v1958_v28 = vor.u32 %v2777_v20, %v1957_v19  ;;  %v2246_v35 = vor.u32 %v2849_v27, %v2245_v26  ;;  %v2837_v19 = vld [vmem:[#allocation2 + $0x250] sm:$0xf0]  ;;  %v2377_v20 = vld [vmem:[#allocation2 + $0x3b0] sm:$0xf]  ;;  %v2930_v26 = vld [vmem:[#allocation2 + $0x538] sm:$0xf0]  ;;  %v2006_v27 = vor.u32 %v2789_v12, %v2005_v11 }
  0x83   :  { %1541 = vmatpush.bf16.msrb.mxu3 %v2590_v32  ;;  %v2774_v32 = vld [vmem:[#allocation2 + $0x58] sm:$0xf0]  ;;  %v2569_v25 = vld [vmem:[#allocation2 + $0x530] sm:$0xf] }
  0x84   :  { %1503 = vmatpush.bf16.msrb.mxu0 %v2290_v43  ;;  %v2846_v43 = vld [vmem:[#allocation2 + $0x298] sm:$0xf0]  ;;  %v1946_v44 = vor.u32 %v2774_v32, %v1945_v31  ;;  %v2378_v32 = vor.u32 %v2882_v21, %v2377_v20  ;;  %v2425_v11 = vld [vmem:[#allocation2 + $0x410] sm:$0xf] }
  0x85   :  { %1516 = vmatpush.bf16.msrb.mxu1 %v2386_v47  ;;  %v1933_v47 = vld [vmem:[#allocation2 + $0x38] sm:$0xf]  ;;  %v2234_v50 = vor.u32 %v2846_v43, %v2233_v42  ;;  %v2903_v43 = vld [vmem:[#allocation2 + $0x460] sm:$0xf0] }
  0x86   :  { %1529 = vmatpush.bf16.msrb.mxu2 %v2482_v48  ;;  %v2771_v48 = vld [vmem:[#allocation2 + $0x40] sm:$0xf0] }
  0x87   :  { %1542 = vmatpush.bf16.msrb.mxu3 %v2578_v51  ;;  %1504 = vmatmul.bf16.vlgmr.msrb.gmra.mxu0 %v3083_v37  ;;  %v2795_v51 = vld [vmem:[#allocation2 + $0x100] sm:$0xf0]  ;;  %v1934_v56 = vor.u32 %v2771_v48, %v1933_v47  ;;  %v2366_v48 = vor.u32 %v2879_v39, %v2365_v36  ;;  %v3108_v39 = vld [vmem:[%s3197_s2] sm:$0x7] }
  0x88   :  { %1548 = vmatpush.bf16.msra.mxu0 %v1994_v52  ;;  %1517 = vmatmul.bf16.vlgmr.msrb.gmra.mxu1 %v3087_v40  ;;  %v2125_v52 = vld [vmem:[#allocation2 + $0x1b8] sm:$0xf]  ;;  %v2030_v57 = vor.u32 %v2795_v51, %v2029_v49  ;;  %v2951_v47 = vld [vmem:[#allocation2 + $0x5e0] sm:$0xf0]  ;;  %v2462_v49 = vor.u32 %v2903_v43, %v2461_v41  ;;  %v2353_v51 = vld [vmem:[#allocation2 + $0x380] sm:$0xf] }
  0x89   :  { %1561 = vmatpush.bf16.msra.mxu1 %v2090_v53  ;;  %1530 = vmatmul.bf16.vlgmr.msrb.gmra.mxu2 %v3081_v34  ;;  %v2819_v53 = vld [vmem:[#allocation2 + $0x1c0] sm:$0xf0]  ;;  %v2305_v43 = vld [vmem:[#allocation2 + $0x320] sm:$0xf] }
  0x8a   :  { %1574 = vmatpush.bf16.msra.mxu2 %v2186_v54  ;;  %1543 = vmatmul.bf16.vlgmr.msrb.gmra.mxu3 %v3085_v38  ;;  %v2221_v54 = vld [vmem:[#allocation2 + $0x278] sm:$0xf] }
  0x8b   :  { %1587 = vmatpush.bf16.msra.mxu3 %v2282_v58  ;;  %v2126_v58 = vor.u32 %v2819_v53, %v2125_v52  ;;  %v2222_v62 = vor.u32 %v2843_v55, %v2221_v54  ;;  %v2876_v52 = vld [vmem:[#allocation2 + $0x388] sm:$0xf0]  ;;  %v2449_v53 = vld [vmem:[#allocation2 + $0x440] sm:$0xf] }
  0x8c   :  { %1549 = vmatpush.bf16.msra.mxu0 %v1982_v1  ;;  %v2113_v1 = vld [vmem:[#allocation2 + $0x1a0] sm:$0xf]  ;;  %v2900_v55 = vld [vmem:[#allocation2 + $0x448] sm:$0xf0]  ;;  %v2354_v60 = vor.u32 %v2876_v52, %v2353_v51  ;;  %v310_v52 = vperm.slane %v3108_v39, 0 }
  0x8d   :  { %1562 = vmatpush.bf16.msra.mxu1 %v2078_v2  ;;  %v2816_v2 = vld [vmem:[#allocation2 + $0x1a8] sm:$0xf0]  ;;  %v2450_v61 = vor.u32 %v2900_v55, %v2449_v53 }
  0x8e   :  { %1575 = vmatpush.bf16.msra.mxu2 %v2174_v3  ;;  %v2209_v3 = vld [vmem:[#allocation2 + $0x260] sm:$0xf]  ;;  %v2114_v10 = vor.u32 %v2816_v2, %v2113_v1  ;;  %v2873_v1 = vld [vmem:[#allocation2 + $0x370] sm:$0xf0]  ;;  %v2936_v51 = vld [vmem:[#allocation2 + $0x568] sm:$0xf0] }
  0x8f   :  { %1588 = vmatpush.bf16.msra.mxu3 %v2270_v7  ;;  %v2765_v7 = vld [vmem:[#allocation2 + $0x10] sm:$0xf0] }
  0x90   :  { %1550 = vmatpush.bf16.msra.mxu0 %v1970_v14  ;;  %v2210_v14 = vor.u32 %v2840_v4, %v2209_v3  ;;  %v1910_v23 = vor.u32 %v2765_v7, %v1909_v6  ;;  %v2897_v3 = vld [vmem:[#allocation2 + $0x430] sm:$0xf0]  ;;  %v2533_v4 = vld [vmem:[#allocation2 + $0x4e8] sm:$0xf] }
  0x91   :  { %1563 = vmatpush.bf16.msra.mxu1 %v2066_v15  ;;  %v2813_v15 = vld [vmem:[#allocation2 + $0x190] sm:$0xf0]  ;;  %v2629_v6 = vld [vmem:[#allocation2 + $0x5a8] sm:$0xf] }
  0x92   :  { %1576 = vmatpush.bf16.msra.mxu2 %v2162_v18  ;;  %v2197_v18 = vld [vmem:[#allocation2 + $0x248] sm:$0xf] }
  0x93   :  { %1589 = vmatpush.bf16.msra.mxu3 %v2258_v22  ;;  %v2473_v22 = vld [vmem:[#allocation2 + $0x470] sm:$0xf]  ;;  %v2198_v31 = vor.u32 %v2837_v19, %v2197_v18  ;;  %v2942_v19 = vld [vmem:[#allocation2 + $0x598] sm:$0xf0] }
  0x94   :  { %1551 = vmatpush.bf16.msra.mxu0 %v1958_v28  ;;  %v2102_v28 = vor.u32 %v2813_v15, %v2101_v13  ;;  %v2474_v33 = vor.u32 %v2906_v24, %v2473_v22  ;;  %v2894_v13 = vld [vmem:[#allocation2 + $0x418] sm:$0xf0]  ;;  %v2617_v18 = vld [vmem:[#allocation2 + $0x590] sm:$0xf]  ;;  %v2317_v24 = vld [vmem:[#allocation2 + $0x338] sm:$0xf] }
  0x95   :  { %1564 = vmatpush.bf16.msra.mxu1 %v2054_v29  ;;  %v2665_v29 = vld [vmem:[#allocation2 + $0x5f0] sm:$0xf]  ;;  %v2918_v15 = vld [vmem:[#allocation2 + $0x4d8] sm:$0xf0]  ;;  %v2426_v22 = vor.u32 %v2894_v13, %v2425_v11 }
  0x96   :  { %1577 = vmatpush.bf16.msra.mxu2 %v2150_v30  ;;  %v2954_v30 = vld [vmem:[#allocation2 + $0x5f8] sm:$0xf0] }
  0x97   :  { %1590 = vmatpush.bf16.msra.mxu3 %v2246_v35  ;;  %v2570_v35 = vor.u32 %v2930_v26, %v2569_v25  ;;  %v2666_v42 = vor.u32 %v2954_v30, %v2665_v29  ;;  %v2867_v25 = vld [vmem:[#allocation2 + $0x340] sm:$0xf0]  ;;  %v2413_v26 = vld [vmem:[#allocation2 + $0x3f8] sm:$0xf] }
  0x98   :  { %1552 = vmatpush.bf16.msra.mxu0 %v1946_v44  ;;  %v2557_v44 = vld [vmem:[#allocation2 + $0x518] sm:$0xf]  ;;  %v2915_v30 = vld [vmem:[#allocation2 + $0x4c0] sm:$0xf0]  ;;  %v2318_v36 = vor.u32 %v2867_v25, %v2317_v24  ;;  %v2957_v25 = vld [vmem:[%s3198_s3 + $0x10] sm:$0xff] }
  0x99   :  { %1565 = vmatpush.bf16.msra.mxu1 %v2042_v45  ;;  %v2927_v45 = vld [vmem:[#allocation2 + $0x520] sm:$0xf0]  ;;  %v2509_v29 = vld [vmem:[#allocation2 + $0x4b8] sm:$0xf] }
  0x9a   :  { %1578 = vmatpush.bf16.msra.mxu2 %v2138_v46  ;;  %v2653_v46 = vld [vmem:[#allocation2 + $0x5d8] sm:$0xf] }
  0x9b   :  { %1591 = vmatpush.bf16.msra.mxu3 %v2234_v50  ;;  %v2558_v50 = vor.u32 %v2927_v45, %v2557_v44  ;;  %v2654_v54 = vor.u32 %v2951_v47, %v2653_v46  ;;  %v2864_v44 = vld [vmem:[#allocation2 + $0x328] sm:$0xf0]  ;;  %v2401_v45 = vld [vmem:[#allocation2 + $0x3e0] sm:$0xf]  ;;  %v2970_v11 = vld [vmem:[%s3198_s3 + $0x78] sm:$0xff] }
  0x9c   :  { %1553 = vmatpush.bf16.msra.mxu0 %v1934_v56  ;;  %v2545_v56 = vld [vmem:[#allocation2 + $0x500] sm:$0xf]  ;;  %v2888_v47 = vld [vmem:[#allocation2 + $0x3e8] sm:$0xf0] }
  0x9d   :  { %1566 = vmatpush.bf16.msra.mxu1 %v2030_v57  ;;  %v2924_v57 = vld [vmem:[#allocation2 + $0x508] sm:$0xf0] }
  0x9e   :  { %1579 = vmatpush.bf16.msra.mxu2 %v2126_v58  ;;  %v2641_v58 = vld [vmem:[#allocation2 + $0x5c0] sm:$0xf] }
  0x9f   :  { %1592 = vmatpush.bf16.msra.mxu3 %v2222_v62  ;;  %v2546_v62 = vor.u32 %v2924_v57, %v2545_v56  ;;  %v2642_v2 = vor.u32 %v2948_v59, %v2641_v58  ;;  %v2402_v56 = vor.u32 %v2888_v47, %v2401_v45  ;;  %v2293_v58 = vld [vmem:[#allocation2 + $0x308] sm:$0xf]  ;;  %v2861_v59 = vld [vmem:[#allocation2 + $0x310] sm:$0xf0] }
  0xa0   :  { %1554 = vmatpush.bf16.msra.mxu0 %v1922_v5  ;;  %v2921_v5 = vld [vmem:[#allocation2 + $0x4f0] sm:$0xf0]  ;;  %v2964_v47 = vld [vmem:[%s3198_s3 + $0x48] sm:$0xff] }
  0xa1   :  { %1567 = vmatpush.bf16.msra.mxu1 %v2018_v8  ;;  %v2329_v8 = vld [vmem:[#allocation2 + $0x350] sm:$0xf] }
  0xa2   :  { %1580 = vmatpush.bf16.msra.mxu2 %v2114_v10  ;;  %v2870_v10 = vld [vmem:[#allocation2 + $0x358] sm:$0xf0] }
  0xa3   :  { %1593 = vmatpush.bf16.msra.mxu3 %v2210_v14  ;;  %v2521_v14 = vld [vmem:[#allocation2 + $0x4d0] sm:$0xf]  ;;  %v2330_v20 = vor.u32 %v2870_v10, %v2329_v8 }
  0xa4   :  { %1555 = vmatpush.bf16.msra.mxu0 %v1910_v23  ;;  %v1349_v21 = vpop.f32.mrf.mxu0  ;;  %v2522_v23 = vor.u32 %v2918_v15, %v2521_v14  ;;  %v2960_v14 = vld [vmem:[%s3198_s3 + $0x28] sm:$0xff] }
  0xa5   :  { %1568 = vmatpush.bf16.msra.mxu1 %v2006_v27  ;;  %v2618_v27 = vor.u32 %v2942_v19, %v2617_v18  ;;  %v2959_v18 = vld [vmem:[%s3198_s3 + $0x20] sm:$0xff] }
  0xa6   :  { %1581 = vmatpush.bf16.msra.mxu2 %v2102_v28  ;;  %v2891_v28 = vld [vmem:[#allocation2 + $0x400] sm:$0xf0] }
  0xa7   :  { %1594 = vmatpush.bf16.msra.mxu3 %v2198_v31  ;;  %1556 = vmatmul.bf16.vlgmr.msra.gmra.mxu0 %v3054_v9  ;;  %v2945_v9 = vld [vmem:[#allocation2 + $0x5b0] sm:$0xf0]  ;;  %v2605_v31 = vld [vmem:[#allocation2 + $0x578] sm:$0xf]  ;;  %v2414_v41 = vor.u32 %v2891_v28, %v2413_v26 }
  0xa8   :  { %1600 = vmatpush.bf16.msrb.mxu0 %v2378_v32  ;;  %1569 = vmatmul.bf16.vlgmr.msra.gmra.mxu1 %v3064_v17  ;;  %v2534_v17 = vor.u32 %v2921_v5, %v2533_v4  ;;  %v2630_v12 = vor.u32 %v2945_v9, %v2629_v6  ;;  %v2939_v32 = vld [vmem:[#allocation2 + $0x580] sm:$0xf0]  ;;  %v2294_v6 = vor.u32 %v2861_v59, %v2293_v58 }
  0xa9   :  { %1613 = vmatpush.bf16.msrb.mxu1 %v2474_v33  ;;  %1582 = vmatmul.bf16.vlgmr.msra.gmra.mxu2 %v3048_v63  ;;  %v2437_v63 = vld [vmem:[#allocation2 + $0x428] sm:$0xf]  ;;  %v1362_v33 = vpop.f32.mrf.mxu1  ;;  %v2606_v46 = vor.u32 %v2939_v32, %v2605_v31  ;;  %v2966_v31 = vld [vmem:[%s3198_s3 + $0x58] sm:$0xff] }
  0xaa   :  { %1626 = vmatpush.bf16.msrb.mxu2 %v2570_v35  ;;  %1595 = vmatmul.bf16.vlgmr.msra.gmra.mxu3 %v3062_v16  ;;  %v2342_v16 = vor.u32 %v2873_v1, %v2341_v0  ;;  %v2438_v7 = vor.u32 %v2897_v3, %v2437_v63  ;;  %v2485_v0 = vld [vmem:[#allocation2 + $0x488] sm:$0xf]  ;;  %v2909_v1 = vld [vmem:[#allocation2 + $0x490] sm:$0xf0]  ;;  %v1350_v3 = vadd.f32 %v1349_v21, %v310_v52 }
  0xab   :  { %1639 = vmatpush.bf16.msrb.mxu3 %v2666_v42  ;;  %v2510_v42 = vor.u32 %v2915_v30, %v2509_v29  ;;  %v2581_v63 = vld [vmem:[#allocation2 + $0x548] sm:$0xf] }
  0xac   :  { %1601 = vmatpush.bf16.msrb.mxu0 %v2366_v48  ;;  %v1375_v35 = vpop.f32.mrf.mxu2  ;;  %v2497_v48 = vld [vmem:[#allocation2 + $0x4a0] sm:$0xf]  ;;  %v1351_v55 = vpop.f32.mrf.mxu0  ;;  %v1363_v8 = vadd.f32 %v1362_v33, %v1350_v3  ;;  %v2956_v30 = vld [vmem:[%s3198_s3 + $0x8] sm:$0xff] }
  0xad   :  { %1614 = vmatpush.bf16.msrb.mxu1 %v2462_v49  ;;  %v2912_v49 = vld [vmem:[#allocation2 + $0x4a8] sm:$0xf0]  ;;  %v1388_v53 = vpop.f32.mrf.mxu3 }
  0xae   :  { %1627 = vmatpush.bf16.msrb.mxu2 %v2558_v50  ;;  %v2593_v50 = vld [vmem:[#allocation2 + $0x560] sm:$0xf]  ;;  %v2498_v57 = vor.u32 %v2912_v49, %v2497_v48  ;;  %v1376_v13 = vadd.f32 %v1375_v35, %v1363_v8 }
  0xaf   :  { %1640 = vmatpush.bf16.msrb.mxu3 %v2654_v54  ;;  %v2306_v54 = vor.u32 %v2864_v44, %v2305_v43  ;;  %v2965_v44 = vld [vmem:[%s3198_s3 + $0x50] sm:$0xff]  ;;  %v2975_v8 = vld [vmem:[%s3198_s3 + $0xa0] sm:$0xff] }
  0xb0   :  { %1602 = vmatpush.bf16.msrb.mxu0 %v2354_v60  ;;  %v2389_v60 = vld [vmem:[#allocation2 + $0x3c8] sm:$0xf]  ;;  %v1389_v15 = vadd.f32 %v1388_v53, %v1376_v13 }
  0xb1   :  { %1615 = vmatpush.bf16.msrb.mxu1 %v2450_v61  ;;  %v2594_v61 = vor.u32 %v2936_v51, %v2593_v50  ;;  %v1364_v4 = vpop.f32.mrf.mxu1  ;;  %v2963_v50 = vld [vmem:[%s3198_s3 + $0x40] sm:$0xff]  ;;  %v311_v51 = vperm.slane %v3108_v39, 1 }
  0xb2   :  { %1628 = vmatpush.bf16.msrb.mxu2 %v2546_v62  ;;  %v2885_v62 = vld [vmem:[#allocation2 + $0x3d0] sm:$0xf0] }
  0xb3   :  { %1641 = vmatpush.bf16.msrb.mxu3 %v2642_v2  ;;  %v2933_v2 = vld [vmem:[#allocation2 + $0x550] sm:$0xf0]  ;;  %v2390_v9 = vor.u32 %v2885_v62, %v2389_v60 }
  0xb4   :  { %1603 = vmatpush.bf16.msrb.mxu0 %v2342_v16  ;;  %v1377_v5 = vpop.f32.mrf.mxu2  ;;  %v2486_v16 = vor.u32 %v2909_v1, %v2485_v0  ;;  %v2977_v4 = vld [vmem:[%s3198_s3 + $0xb0] sm:$0xff] }
  0xb5   :  { %1616 = vmatpush.bf16.msrb.mxu1 %v2438_v7  ;;  %v2582_v7 = vor.u32 %v2933_v2, %v2581_v63  ;;  %v1390_v10 = vpop.f32.mrf.mxu3  ;;  %v2978_v63 = vld [vmem:[%s3198_s3 + $0xb8] sm:$0xff] }
  0xb6   :  { %1629 = vmatpush.bf16.msrb.mxu2 %v2534_v17  ;;  %v2962_v17 = vld [vmem:[%s3198_s3 + $0x38] sm:$0xff] }
  0xb7   :  { %1642 = vmatpush.bf16.msrb.mxu3 %v2630_v12  ;;  %v2961_v12 = vld [vmem:[%s3198_s3 + $0x30] sm:$0xff]  ;;  %v2974_v10 = vld [vmem:[%s3198_s3 + $0x98] sm:$0xff] }
  0xb8   :  { %1604 = vmatpush.bf16.msrb.mxu0 %v2330_v20 }
  0xb9   :  { %1617 = vmatpush.bf16.msrb.mxu1 %v2426_v22 }
  0xba   :  { %1630 = vmatpush.bf16.msrb.mxu2 %v2522_v23  ;;  %v2968_v23 = vld [vmem:[%s3198_s3 + $0x68] sm:$0xff] }
  0xbb   :  { %1643 = vmatpush.bf16.msrb.mxu3 %v2618_v27  ;;  %v2967_v27 = vld [vmem:[%s3198_s3 + $0x60] sm:$0xff] }
  0xbc   :  { %1605 = vmatpush.bf16.msrb.mxu0 %v2318_v36  ;;  %v2955_v36 = vld [vmem:[%s3198_s3] sm:$0xff] }
  0xbd   :  { %1618 = vmatpush.bf16.msrb.mxu1 %v2414_v41 }
  0xbe   :  { %1631 = vmatpush.bf16.msrb.mxu2 %v2510_v42 }
  0xbf   :  { %1644 = vmatpush.bf16.msrb.mxu3 %v2606_v46 }
  0xc0   :  { %1606 = vmatpush.bf16.msrb.mxu0 %v2306_v54 }
  0xc1   :  { %1619 = vmatpush.bf16.msrb.mxu1 %v2402_v56 }
  0xc2   :  { %1632 = vmatpush.bf16.msrb.mxu2 %v2498_v57 }
  0xc3   :  { %1645 = vmatpush.bf16.msrb.mxu3 %v2594_v61 }
  0xc4   :  { %1607 = vmatpush.bf16.msrb.mxu0 %v2294_v6 }
  0xc5   :  { %1620 = vmatpush.bf16.msrb.mxu1 %v2390_v9  ;;  %v1414_v20 = vpop.f32.mrf.mxu1 }
  0xc6   :  { %1633 = vmatpush.bf16.msrb.mxu2 %v2486_v16  ;;  %v2976_v16 = vld [vmem:[%s3198_s3 + $0xa8] sm:$0xff] }
  0xc7   :  { %1646 = vmatpush.bf16.msrb.mxu3 %v2582_v7  ;;  %1608 = vmatmul.bf16.vlgmr.msrb.gmra.mxu0 %v3083_v37  ;;  %v1401_v37 = vpop.f32.mrf.mxu0 }
  0xc8   :  { %1854 = vmatpush.bf16.msra.mxu0 %v2962_v17  ;;  %1621 = vmatmul.bf16.vlgmr.msrb.gmra.mxu1 %v3087_v40  ;;  %v1402_v19 = vadd.f32 %v1401_v37, %v1389_v15 }
  0xc9   :  { %1867 = vmatpush.bf16.msra.mxu1 %v2970_v11  ;;  %1634 = vmatmul.bf16.vlgmr.msrb.gmra.mxu2 %v3081_v34  ;;  %v2969_v34 = vld [vmem:[%s3198_s3 + $0x70] sm:$0xff] }
  0xca   :  { %1647 = vmatmul.bf16.vlgmr.msrb.gmra.mxu3 %v3085_v38  ;;  %v1415_v40 = vadd.f32 %v1414_v20, %v1402_v19  ;;  %v2958_v38 = vld [vmem:[%s3198_s3 + $0x18] sm:$0xff]  ;;  %1880 = vmatpush.bf16.msra.mxu2 %v2978_v63  ;;  %v2973_v11 = vld [vmem:[%s3198_s3 + $0x90] sm:$0xff]  ;;  %v2971_v19 = vld [vmem:[%s3198_s3 + $0x80] sm:$0xff] }
  0xcc   :  { %1855 = vmatpush.bf16.msra.mxu0 %v2961_v12  ;;  %v1427_v21 = vpop.f32.mrf.mxu2 }
  0xcd   :  { %1868 = vmatpush.bf16.msra.mxu1 %v2969_v34  ;;  %v1440_v22 = vpop.f32.mrf.mxu3  ;;  %v1428_v24 = vadd.f32 %v1427_v21, %v1415_v40  ;;  %v1416_v28 = vpop.f32.mrf.mxu1  ;;  %v312_v34 = vperm.slane %v3108_v39, 2 }
  0xce   :  { %1881 = vmatpush.bf16.msra.mxu2 %v2977_v4 }
  0xcf   :  { %v1403_v26 = vpop.f32.mrf.mxu0  ;;  %v1441_v29 = vadd.f32 %v1440_v22, %v1428_v24 }
  0xd0   :  { %1856 = vmatpush.bf16.msra.mxu0 %v2960_v14  ;;  %v2972_v14 = vld [vmem:[%s3198_s3 + $0x88] sm:$0xff] }
  0xd1   :  { %1869 = vmatpush.bf16.msra.mxu1 %v2968_v23  ;;  %v1652_v35 = vmax.f32 %v1441_v29, 0.0 }
  0xd2   :  { %1882 = vmatpush.bf16.msra.mxu2 %v2976_v16 }
  0xd3   :  { %v1655_v41 = vpack.c.bf16 %v1652_v35, %v1652_v35 }
  0xd4   :  { %1857 = vmatpush.bf16.msra.mxu0 %v2959_v18  ;;  %v1429_v32 = vpop.f32.mrf.mxu2 }
  0xd5   :  { %1870 = vmatpush.bf16.msra.mxu1 %v2967_v27  ;;  %v1442_v33 = vpop.f32.mrf.mxu3 }
  0xd6   :  { %1883 = vmatpush.bf16.msra.mxu2 %v2975_v8 }
  0xd8   :  { %1858 = vmatpush.bf16.msra.mxu0 %v2958_v38 }
  0xd9   :  { %1871 = vmatpush.bf16.msra.mxu1 %v2966_v31 }
  0xda   :  { %1884 = vmatpush.bf16.msra.mxu2 %v2974_v10 }
  0xdc   :  { %1859 = vmatpush.bf16.msra.mxu0 %v2957_v25 }
  0xdd   :  { %1872 = vmatpush.bf16.msra.mxu1 %v2965_v44 }
  0xde   :  { %1885 = vmatpush.bf16.msra.mxu2 %v2973_v11 }
  0xe0   :  { %1860 = vmatpush.bf16.msra.mxu0 %v2956_v30 }
  0xe1   :  { %1873 = vmatpush.bf16.msra.mxu1 %v2964_v47 }
  0xe2   :  { %1886 = vmatpush.bf16.msra.mxu2 %v2972_v14 }
  0xe4   :  { %1861 = vmatpush.bf16.msra.mxu0 %v2955_v36  ;;  %v1453_v42 = vpop.f32.mrf.mxu0 }
  0xe5   :  { %v1466_v43 = vpop.f32.mrf.mxu1  ;;  %1874 = vmatpush.bf16.msra.mxu1 %v2963_v50  ;;  %v1454_v54 = vadd.f32 %v1453_v42, %v311_v51 }
  0xe6   :  { %1887 = vmatpush.bf16.msra.mxu2 %v2971_v19 }
  0xe7   :  { %1862 = vmatmul.bf16.vlgmr.msra.gmra.mxu0 %v1655_v41  ;;  %v1467_v55 = vadd.f32 %v1466_v43, %v1454_v54 }
  0xec   :  { %v1479_v45 = vpop.f32.mrf.mxu2  ;;  %v1455_v48 = vpop.f32.mrf.mxu0 }
  0xed   :  { %v1492_v46 = vpop.f32.mrf.mxu3  ;;  %v1468_v49 = vpop.f32.mrf.mxu1  ;;  %v1480_v56 = vadd.f32 %v1479_v45, %v1467_v55  ;;  %v2982_v45 = vld [vmem:[%s3199_s4] ss:$0 sm:$0xff] }
  0xef   :  { %v1493_v57 = vadd.f32 %v1492_v46, %v1480_v56 }
  0xf4   :  { %v1481_v52 = vpop.f32.mrf.mxu2 }
  0xf5   :  { %v1494_v53 = vpop.f32.mrf.mxu3 }
 0x104   :  { %v1505_v58 = vpop.f32.mrf.mxu0 }
 0x105   :  { %v1506_v59 = vadd.f32 %v1505_v58, %v1493_v57  ;;  %v1518_v60 = vpop.f32.mrf.mxu1 }
 0x107   :  { %v1519_v61 = vadd.f32 %v1518_v60, %v1506_v59 }
 0x10c   :  { %v1531_v62 = vpop.f32.mrf.mxu2  ;;  %v1507_v3 = vpop.f32.mrf.mxu0 }
 0x10d   :  { %v1532_v0 = vadd.f32 %v1531_v62, %v1519_v61  ;;  %v1544_v1 = vpop.f32.mrf.mxu3  ;;  %v1520_v5 = vpop.f32.mrf.mxu1 }
 0x10f   :  { %v1545_v2 = vadd.f32 %v1544_v1, %v1532_v0 }
 0x111   :  { %v1653_v6 = vmax.f32 %v1545_v2, 0.0 }
 0x113   :  { %v1656_v9 = vpack.c.bf16 %v1653_v6, %v1653_v6 }
 0x114   :  { %v1533_v7 = vpop.f32.mrf.mxu2 }
 0x115   :  { %1875 = vmatmul.bf16.vlgmr.msra.gmra.mxu1 %v1656_v9  ;;  %v1546_v17 = vpop.f32.mrf.mxu3 }
 0x124   :  { %v1557_v12 = vpop.f32.mrf.mxu0 }
 0x125   :  { %v1570_v13 = vpop.f32.mrf.mxu1  ;;  %v1558_v21 = vadd.f32 %v1557_v12, %v312_v34 }
 0x127   :  { %v1571_v22 = vadd.f32 %v1570_v13, %v1558_v21 }
 0x12c   :  { %v1583_v15 = vpop.f32.mrf.mxu2  ;;  %v1559_v37 = vpop.f32.mrf.mxu0 }
 0x12d   :  { %v1596_v18 = vpop.f32.mrf.mxu3  ;;  %v1572_v20 = vpop.f32.mrf.mxu1  ;;  %v1584_v23 = vadd.f32 %v1583_v15, %v1571_v22 }
 0x12f   :  { %v1597_v24 = vadd.f32 %v1596_v18, %v1584_v23 }
 0x134   :  { %v1585_v40 = vpop.f32.mrf.mxu2 }
 0x135   :  { %v1598_v38 = vpop.f32.mrf.mxu3 }
 0x144   :  { %v1609_v25 = vpop.f32.mrf.mxu0 }
 0x145   :  { %v1622_v26 = vpop.f32.mrf.mxu1  ;;  %v1610_v27 = vadd.f32 %v1609_v25, %v1597_v24 }
 0x147   :  { %v1623_v28 = vadd.f32 %v1622_v26, %v1610_v27 }
 0x14c   :  { %v1635_v29 = vpop.f32.mrf.mxu2  ;;  %v1611_v32 = vpop.f32.mrf.mxu0 }
 0x14d   :  { %v1636_v30 = vadd.f32 %v1635_v29, %v1623_v28  ;;  %v1648_v31 = vpop.f32.mrf.mxu3  ;;  %v1624_v33 = vpop.f32.mrf.mxu1 }
 0x14f   :  { %v1649_v35 = vadd.f32 %v1648_v31, %v1636_v30 }
 0x151   :  { %v1654_v36 = vmax.f32 %v1649_v35, 0.0 }
 0x153   :  { %v1657_v41 = vpack.c.bf16 %v1654_v36, %v1654_v36 }
 0x154   :  { %v1637_v42 = vpop.f32.mrf.mxu2 }
 0x155   :  { %v1650_v39 = vpop.f32.mrf.mxu3  ;;  %1888 = vmatmul.bf16.vlgmr.msra.gmra.mxu2 %v1657_v41 }
 0x164   :  { %v1863_v43 = vpop.f32.mrf.mxu0 }
 0x165   :  { %v1864_v46 = vadd.f32 %v2982_v45, %v1863_v43 }
 0x16c   :  { %v1865_v44 = vpop.f32.mrf.mxu0 }
 0x192   :  { %v1876_v47 = vpop.f32.mrf.mxu1 }
 0x193   :  { %v1877_v48 = vadd.f32 %v1876_v47, %v1864_v46 }
 0x19a   :  { %v1878_v49 = vpop.f32.mrf.mxu1 }
 0x1d8   :  { %v1889_v50 = vpop.f32.mrf.mxu2 }
 0x1d9   :  { %v1890_v51 = vadd.f32 %v1889_v50, %v1877_v48 }
 0x1db   :  { %1893 = vst [vmem:[%s3200_s5] sm:$0xff] %v1890_v51 }
 0x1e0   :  { %v1891_v52 = vpop.f32.mrf.mxu2 }
 0x1e1   :  { %1898 = vsyncpa [#allocation3], 1 }

</bundles_post_ra>
